<compile_context>
chip_gen: v7x
topology: tpu7x:2x2x1
jax: 0.10.0
libtpu: 0.0.40
codegen_flags: <defaults>
</compile_context>

<pallas_src>
import functools
import math

import jax
import jax.numpy as jnp
from jax.experimental import pallas as pl
from jax.experimental.pallas import tpu as pltpu


# ----------------------------- tile-size helper -----------------------------

def _pick_tile(dim, cap, aligns=(128, 8)):
    """Largest tile <= cap that divides `dim` and is a multiple of one of `aligns`;
    falls back to the full dimension (always a legal block size)."""
    if dim <= cap:
        return dim
    for align in aligns:
        t = (cap // align) * align
        while t >= align:
            if dim % t == 0:
                return t
            t -= align
    return dim


# ----------------------------- Fused KQV projection -----------------------------

def _kqv_kernel(x_ref, wk_ref, wq_ref, wv_ref, bk_ref, bq_ref, bv_ref,
                k_out, q_out, v_out, acc_k, acc_q, acc_v):
    kk = pl.program_id(2)

    @pl.when(kk == 0)
    def _init():
        acc_k[...] = jnp.zeros_like(acc_k)
        acc_q[...] = jnp.zeros_like(acc_q)
        acc_v[...] = jnp.zeros_like(acc_v)

    x = x_ref[...]   # load the x tile once; reused by all three MXU matmuls
    acc_k[...] += jnp.dot(x, wk_ref[...], preferred_element_type=jnp.float32)
    acc_q[...] += jnp.dot(x, wq_ref[...], preferred_element_type=jnp.float32)
    acc_v[...] += jnp.dot(x, wv_ref[...], preferred_element_type=jnp.float32)

    @pl.when(kk == pl.num_programs(2) - 1)
    def _finalize():
        k_out[...] = (acc_k[...] + bk_ref[...]).astype(k_out.dtype)
        q_out[...] = (acc_q[...] + bq_ref[...]).astype(q_out.dtype)
        v_out[...] = (acc_v[...] + bv_ref[...]).astype(v_out.dtype)


def pallas_kqv_projection(x2d, w_k, w_q, w_v, b_k, b_q, b_v,
                          *, tm_cap=512, tn_cap=256, tk_cap=512):
    """K, Q, V = x2d @ w_{k,q,v} + b_{k,q,v}, fused in one pipelined pallas_call."""
    M, K = x2d.shape
    N = w_k.shape[1]
    tm = _pick_tile(M, tm_cap, aligns=(128, 8))   # sublane dim
    tn = _pick_tile(N, tn_cap, aligns=(128,))     # lane dim
    tk = _pick_tile(K, tk_cap, aligns=(128,))     # lane (x) / sublane (w) dim
    grid = (M // tm, N // tn, K // tk)

    x_spec = pl.BlockSpec((tm, tk), lambda i, j, k: (i, k))
    w_spec = pl.BlockSpec((tk, tn), lambda i, j, k: (k, j))
    b_spec = pl.BlockSpec((1, tn), lambda i, j, k: (0, j))
    o_spec = pl.BlockSpec((tm, tn), lambda i, j, k: (i, j))

    out_shape = jax.ShapeDtypeStruct((M, N), x2d.dtype)
    return pl.pallas_call(
        _kqv_kernel,
        out_shape=(out_shape, out_shape, out_shape),
        grid=grid,
        in_specs=[x_spec, w_spec, w_spec, w_spec, b_spec, b_spec, b_spec],
        out_specs=(o_spec, o_spec, o_spec),
        scratch_shapes=[pltpu.VMEM((tm, tn), jnp.float32)] * 3,
        compiler_params=pltpu.CompilerParams(
            dimension_semantics=("parallel", "parallel", "arbitrary"),
            vmem_limit_bytes=32 * 1024 * 1024,
        ),
    )(x2d, w_k, w_q, w_v,
      b_k.reshape(1, N), b_q.reshape(1, N), b_v.reshape(1, N))


# ----------------------------- Tiled linear (matmul + bias) -----------------------------

def _linear_kernel(x_ref, w_ref, b_ref, o_ref, acc_ref):
    k = pl.program_id(2)

    @pl.when(k == 0)
    def _init():
        acc_ref[...] = jnp.zeros_like(acc_ref)

    acc_ref[...] += jnp.dot(x_ref[...], w_ref[...],
                            preferred_element_type=jnp.float32)

    @pl.when(k == pl.num_programs(2) - 1)
    def _finalize():
        o_ref[...] = (acc_ref[...] + b_ref[...]).astype(o_ref.dtype)


def pallas_linear(x2d, w, b, *, tm_cap=512, tn_cap=256, tk_cap=512):
    """y = x2d @ w + b, tiled over (M, N, K) with a VMEM f32 accumulator."""
    M, K = x2d.shape
    _, N = w.shape
    tm = _pick_tile(M, tm_cap, aligns=(128, 8))
    tn = _pick_tile(N, tn_cap, aligns=(128,))
    tk = _pick_tile(K, tk_cap, aligns=(128,))
    grid = (M // tm, N // tn, K // tk)

    return pl.pallas_call(
        _linear_kernel,
        out_shape=jax.ShapeDtypeStruct((M, N), x2d.dtype),
        grid=grid,
        in_specs=[
            pl.BlockSpec((tm, tk), lambda i, j, k: (i, k)),
            pl.BlockSpec((tk, tn), lambda i, j, k: (k, j)),
            pl.BlockSpec((1, tn), lambda i, j, k: (0, j)),
        ],
        out_specs=pl.BlockSpec((tm, tn), lambda i, j, k: (i, j)),
        scratch_shapes=[pltpu.VMEM((tm, tn), jnp.float32)],
        compiler_params=pltpu.CompilerParams(
            dimension_semantics=("parallel", "parallel", "arbitrary"),
            vmem_limit_bytes=32 * 1024 * 1024,
        ),
    )(x2d, w, b.reshape(1, N))


# ----------------------------- Flash-style causal attention -----------------------------

def _flash_attn_kernel(q_ref, k_ref, v_ref, o_ref, m_ref, l_ref, acc_ref,
                       *, scale, num_heads, d_k):
    qi = pl.program_id(1)
    ki = pl.program_id(2)

    @pl.when(ki == 0)
    def _init():
        m_ref[...] = jnp.full_like(m_ref, -jnp.inf)
        l_ref[...] = jnp.zeros_like(l_ref)
        acc_ref[...] = jnp.zeros_like(acc_ref)

    def _accumulate(apply_causal_mask):
        tq = q_ref.shape[1]
        tkv = k_ref.shape[1]
        if apply_causal_mask:
            # Only the diagonal tile needs the mask (tq == tkv).
            row = jax.lax.broadcasted_iota(jnp.int32, (tq, tkv), 0)
            col = jax.lax.broadcasted_iota(jnp.int32, (tq, tkv), 1)
            mask = col > row
        for h in range(num_heads):
            sl = slice(h * d_k, (h + 1) * d_k)
            qh = q_ref[0, :, sl] * scale                      # (tq, d_k)
            kh = k_ref[0, :, sl]                              # (tkv, d_k)
            vh = v_ref[0, :, sl]                              # (tkv, d_k)

            s = jnp.dot(qh, kh.T, preferred_element_type=jnp.float32)  # (tq, tkv)
            if apply_causal_mask:
                s = jnp.where(mask, -jnp.inf, s)

            m_prev = m_ref[h]                                 # (tq, 1)
            m_new = jnp.maximum(m_prev, jnp.max(s, axis=-1, keepdims=True))
            alpha = jnp.exp(m_prev - m_new)
            p = jnp.exp(s - m_new)                            # (tq, tkv)

            l_ref[h] = alpha * l_ref[h] + jnp.sum(p, axis=-1, keepdims=True)
            acc_ref[h] = alpha * acc_ref[h] + jnp.dot(
                p.astype(vh.dtype), vh, preferred_element_type=jnp.float32)
            m_ref[h] = m_new

    # KV tiles strictly below the diagonal: mask-free fast path.
    @pl.when(ki < qi)
    def _off_diag():
        _accumulate(False)

    # Diagonal tile: apply mask, then this is the last useful KV tile for this q tile ->
    # normalize once and emit the output with a single lane-dense (tq, D) store.
    @pl.when(ki == qi)
    def _diag_and_finalize():
        _accumulate(True)
        slabs = []
        for h in range(num_heads):
            inv_l = pl.reciprocal(l_ref[h], approx=False)     # (tq, 1)
            slabs.append(acc_ref[h] * inv_l)                  # (tq, d_k)
        o_ref[0] = jnp.concatenate(slabs, axis=-1).astype(o_ref.dtype)

    # KV tiles strictly above the diagonal contribute nothing: no compute, DMA clamped.


def pallas_flash_attention(q, k, v, num_heads):
    """q, k, v: (B, T, d_model) with heads packed in the last dim -> (B, T, d_model)."""
    B, T, D = q.shape
    d_k = D // num_heads
    scale = 1.0 / math.sqrt(d_k)
    t = _pick_tile(T, 256, aligns=(128, 8))   # tq == tkv
    nt = T // t

    q_spec = pl.BlockSpec((1, t, D), lambda b, qi, ki: (b, qi, 0))
    # Clamp the KV block index so skipped (above-diagonal) steps re-use the previous
    # block -> Pallas elides the redundant DMA.
    kv_spec = pl.BlockSpec((1, t, D), lambda b, qi, ki: (b, jnp.minimum(qi, ki), 0))
    o_spec = pl.BlockSpec((1, t, D), lambda b, qi, ki: (b, qi, 0))

    kernel = functools.partial(
        _flash_attn_kernel, scale=scale, num_heads=num_heads, d_k=d_k)

    return pl.pallas_call(
        kernel,
        out_shape=jax.ShapeDtypeStruct((B, T, D), q.dtype),
        grid=(B, nt, nt),
        in_specs=[q_spec, kv_spec, kv_spec],
        out_specs=o_spec,
        scratch_shapes=[
            pltpu.VMEM((num_heads, t, 1), jnp.float32),    # running max m
            pltpu.VMEM((num_heads, t, 1), jnp.float32),    # running denom l
            pltpu.VMEM((num_heads, t, d_k), jnp.float32),  # output accumulator
        ],
        compiler_params=pltpu.CompilerParams(
            dimension_semantics=("parallel", "parallel", "arbitrary"),
            vmem_limit_bytes=32 * 1024 * 1024,
        ),
    )(q, k, v)


# ----------------------------- Full module forward -----------------------------

def multi_headed_attention_block(x, params, num_heads):
    B, T, d_model = x.shape
    x2d = x.reshape(B * T, d_model)

    # PyTorch column layout of nn.Linear(d_model, 3*d_model) with 'B T (n H)' rearrange
    # is [K | Q | V], heads innermost -> split the packed weight into three column slices
    # (tiny, weight-only) and run ONE fused projection kernel.
    w = params["w_kqv"]
    b = params["b_kqv"]
    w_k, w_q, w_v = (w[:, :d_model], w[:, d_model:2 * d_model], w[:, 2 * d_model:])
    b_k, b_q, b_v = (b[:d_model], b[d_model:2 * d_model], b[2 * d_model:])

    K, Q, V = pallas_kqv_projection(x2d, w_k, w_q, w_v, b_k, b_q, b_v)
    K = K.reshape(B, T, d_model)
    Q = Q.reshape(B, T, d_model)
    V = V.reshape(B, T, d_model)

    attn = pallas_flash_attention(Q, K, V, num_heads)          # (B, T, d_model)

    out = pallas_linear(attn.reshape(B * T, d_model), params["w_o"], params["b_o"])
    return out.reshape(B, T, d_model)


# ----------------------------- Parameter init (deterministic) -----------------------------

def init_params(key, d_model):
    k1, k2, k3, k4 = jax.random.split(key, 4)
    bound = 1.0 / math.sqrt(d_model)
    # Stored as (in, out) so kernels compute x @ W + b (== PyTorch x @ weight.T + bias).
    return {
        "w_kqv": jax.random.uniform(k1, (d_model, 3 * d_model), jnp.float32, -bound, bound),
        "b_kqv": jax.random.uniform(k2, (3 * d_model,), jnp.float32, -bound, bound),
        "w_o":   jax.random.uniform(k3, (d_model, d_model), jnp.float32, -bound, bound),
        "b_o":   jax.random.uniform(k4, (d_model,), jnp.float32, -bound, bound),
    }


# ----------------------------- Pure-JAX reference (for validation) -----------------------------

def reference_forward(x, params, num_heads):
    B, T, d_model = x.shape
    d_k = d_model // num_heads
    kqv = x @ params["w_kqv"] + params["b_kqv"]
    kqv = kqv.reshape(B, T, 3, num_heads, d_k)
    kqv = jnp.transpose(kqv, (2, 0, 3, 1, 4))
    K, Q, V = kqv[0], kqv[1], kqv[2]
    s = jnp.einsum("bntd,bnTd->bntT", Q, K)
    mask = jnp.triu(jnp.ones((T, T), dtype=bool), k=1)
    s = jnp.where(mask, -jnp.inf, s)
    p = jax.nn.softmax(s / math.sqrt(d_k), axis=-1)
    attn = p @ V
    attn = jnp.transpose(attn, (0, 2, 1, 3)).reshape(B, T, d_model)
    return attn @ params["w_o"] + params["b_o"]


if __name__ == "__main__":
    B, T, d_model, num_heads = 2, 8, 32, 4

    key = jax.random.PRNGKey(0)
    kx, kp = jax.random.split(key)
    x = jax.random.normal(kx, (B, T, d_model), jnp.float32)
    params = init_params(kp, d_model)

    fwd = jax.jit(functools.partial(multi_headed_attention_block, num_heads=num_heads))
    out = jax.block_until_ready(fwd(x, params))

    ref = reference_forward(x, params, num_heads)
    assert out.shape == (B, T, d_model)
    assert jnp.allclose(out, ref, atol=1e-4, rtol=1e-4), "mismatch vs pure-JAX reference"

    print("KERNEL_OK")
</pallas_src>

<mosaic_0001>
module attributes {stable_mosaic.version = 11 : i64} {
  func.func @_kqv_kernel(%arg0: i32, %arg1: i32, %arg2: i32, %arg3: memref<16x32xf32, #tpu.memory_space<vmem>>, %arg4: memref<32x32xf32, #tpu.memory_space<vmem>>, %arg5: memref<32x32xf32, #tpu.memory_space<vmem>>, %arg6: memref<32x32xf32, #tpu.memory_space<vmem>>, %arg7: memref<1x32xf32, #tpu.memory_space<vmem>>, %arg8: memref<1x32xf32, #tpu.memory_space<vmem>>, %arg9: memref<1x32xf32, #tpu.memory_space<vmem>>, %arg10: memref<16x32xf32, #tpu.memory_space<vmem>>, %arg11: memref<16x32xf32, #tpu.memory_space<vmem>>, %arg12: memref<16x32xf32, #tpu.memory_space<vmem>>, %arg13: memref<16x32xf32, #tpu.memory_space<vmem>>, %arg14: memref<16x32xf32, #tpu.memory_space<vmem>>, %arg15: memref<16x32xf32, #tpu.memory_space<vmem>>) attributes {dimension_semantics = [#tpu.dimension_semantics<parallel>, #tpu.dimension_semantics<parallel>, #tpu.dimension_semantics<arbitrary>], iteration_bounds = array<i64: 1, 1, 1>, scalar_prefetch = 0 : i64, scratch_operands = 3 : i64, tpu.core_type = #tpu.core_type<tc>, window_params = [{transform_indices = @transform_0, window_bounds = array<i64: 16, 32>}, {transform_indices = @transform_1, window_bounds = array<i64: 32, 32>}, {transform_indices = @transform_2, window_bounds = array<i64: 32, 32>}, {transform_indices = @transform_3, window_bounds = array<i64: 32, 32>}, {transform_indices = @transform_4, window_bounds = array<i64: 1, 32>}, {transform_indices = @transform_5, window_bounds = array<i64: 1, 32>}, {transform_indices = @transform_6, window_bounds = array<i64: 1, 32>}, {transform_indices = @transform_7, window_bounds = array<i64: 16, 32>}, {transform_indices = @transform_8, window_bounds = array<i64: 16, 32>}, {transform_indices = @transform_9, window_bounds = array<i64: 16, 32>}]} {
    %c0_i32 = arith.constant 0 : i32
    %0 = arith.cmpi eq, %arg2, %c0_i32 : i32
    %1 = arith.extui %0 : i1 to i32
    %c0_i32_0 = arith.constant 0 : i32
    %2 = arith.cmpi ne, %1, %c0_i32_0 : i32
    scf.if %2 {
      %cst_24 = arith.constant 0.000000e+00 : f32
      %22 = vector.broadcast %cst_24 : f32 to vector<16x32xf32>
      %c0_25 = arith.constant 0 : index
      %c0_26 = arith.constant 0 : index
      %23 = vector.load %arg13[%c0_25, %c0_26] : memref<16x32xf32, #tpu.memory_space<vmem>>, vector<16x32xf32>
      tpu.vector_store %arg13[%c0_25, %c0_26], %22 {strides = array<i32>} : memref<16x32xf32, #tpu.memory_space<vmem>>, vector<16x32xf32>,
      %cst_27 = arith.constant 0.000000e+00 : f32
      %24 = vector.broadcast %cst_27 : f32 to vector<16x32xf32>
      %c0_28 = arith.constant 0 : index
      %c0_29 = arith.constant 0 : index
      %25 = vector.load %arg14[%c0_28, %c0_29] : memref<16x32xf32, #tpu.memory_space<vmem>>, vector<16x32xf32>
      tpu.vector_store %arg14[%c0_28, %c0_29], %24 {strides = array<i32>} : memref<16x32xf32, #tpu.memory_space<vmem>>, vector<16x32xf32>,
      %cst_30 = arith.constant 0.000000e+00 : f32
      %26 = vector.broadcast %cst_30 : f32 to vector<16x32xf32>
      %c0_31 = arith.constant 0 : index
      %c0_32 = arith.constant 0 : index
      %27 = vector.load %arg15[%c0_31, %c0_32] : memref<16x32xf32, #tpu.memory_space<vmem>>, vector<16x32xf32>
      tpu.vector_store %arg15[%c0_31, %c0_32], %26 {strides = array<i32>} : memref<16x32xf32, #tpu.memory_space<vmem>>, vector<16x32xf32>,
    } else {
    }
    %c0 = arith.constant 0 : index
    %c0_1 = arith.constant 0 : index
    %3 = vector.load %arg3[%c0, %c0_1] : memref<16x32xf32, #tpu.memory_space<vmem>>, vector<16x32xf32>
    %c0_2 = arith.constant 0 : index
    %c0_3 = arith.constant 0 : index
    %4 = vector.load %arg13[%c0_2, %c0_3] : memref<16x32xf32, #tpu.memory_space<vmem>>, vector<16x32xf32>
    %c0_4 = arith.constant 0 : index
    %c0_5 = arith.constant 0 : index
    %5 = vector.load %arg4[%c0_4, %c0_5] : memref<32x32xf32, #tpu.memory_space<vmem>>, vector<32x32xf32>
    %cst = arith.constant dense<0.000000e+00> : vector<16x32xf32>
    %6 = tpu.matmul %3, %5, %cst {dimension_numbers = #tpu.dot_dimension_numbers<[1], [0], [0], [1], [0, 0, 1, 1], [], []>} : vector<16x32xf32>, vector<32x32xf32>, vector<16x32xf32> -> vector<16x32xf32>
    %7 = arith.addf %4, %6 : vector<16x32xf32>
    %c0_6 = arith.constant 0 : index
    %c0_7 = arith.constant 0 : index
    %8 = vector.load %arg13[%c0_6, %c0_7] : memref<16x32xf32, #tpu.memory_space<vmem>>, vector<16x32xf32>
    tpu.vector_store %arg13[%c0_6, %c0_7], %7 {strides = array<i32>} : memref<16x32xf32, #tpu.memory_space<vmem>>, vector<16x32xf32>,
    %c0_8 = arith.constant 0 : index
    %c0_9 = arith.constant 0 : index
    %9 = vector.load %arg14[%c0_8, %c0_9] : memref<16x32xf32, #tpu.memory_space<vmem>>, vector<16x32xf32>
    %c0_10 = arith.constant 0 : index
    %c0_11 = arith.constant 0 : index
    %10 = vector.load %arg5[%c0_10, %c0_11] : memref<32x32xf32, #tpu.memory_space<vmem>>, vector<32x32xf32>
    %cst_12 = arith.constant dense<0.000000e+00> : vector<16x32xf32>
    %11 = tpu.matmul %3, %10, %cst_12 {dimension_numbers = #tpu.dot_dimension_numbers<[1], [0], [0], [1], [0, 0, 1, 1], [], []>} : vector<16x32xf32>, vector<32x32xf32>, vector<16x32xf32> -> vector<16x32xf32>
    %12 = arith.addf %9, %11 : vector<16x32xf32>
    %c0_13 = arith.constant 0 : index
    %c0_14 = arith.constant 0 : index
    %13 = vector.load %arg14[%c0_13, %c0_14] : memref<16x32xf32, #tpu.memory_space<vmem>>, vector<16x32xf32>
    tpu.vector_store %arg14[%c0_13, %c0_14], %12 {strides = array<i32>} : memref<16x32xf32, #tpu.memory_space<vmem>>, vector<16x32xf32>,
    %c0_15 = arith.constant 0 : index
    %c0_16 = arith.constant 0 : index
    %14 = vector.load %arg15[%c0_15, %c0_16] : memref<16x32xf32, #tpu.memory_space<vmem>>, vector<16x32xf32>
    %c0_17 = arith.constant 0 : index
    %c0_18 = arith.constant 0 : index
    %15 = vector.load %arg6[%c0_17, %c0_18] : memref<32x32xf32, #tpu.memory_space<vmem>>, vector<32x32xf32>
    %cst_19 = arith.constant dense<0.000000e+00> : vector<16x32xf32>
    %16 = tpu.matmul %3, %15, %cst_19 {dimension_numbers = #tpu.dot_dimension_numbers<[1], [0], [0], [1], [0, 0, 1, 1], [], []>} : vector<16x32xf32>, vector<32x32xf32>, vector<16x32xf32> -> vector<16x32xf32>
    %17 = arith.addf %14, %16 : vector<16x32xf32>
    %c0_20 = arith.constant 0 : index
    %c0_21 = arith.constant 0 : index
    %18 = vector.load %arg15[%c0_20, %c0_21] : memref<16x32xf32, #tpu.memory_space<vmem>>, vector<16x32xf32>
    tpu.vector_store %arg15[%c0_20, %c0_21], %17 {strides = array<i32>} : memref<16x32xf32, #tpu.memory_space<vmem>>, vector<16x32xf32>,
    %c0_i32_22 = arith.constant 0 : i32
    %19 = arith.cmpi eq, %arg2, %c0_i32_22 : i32
    %20 = arith.extui %19 : i1 to i32
    %c0_i32_23 = arith.constant 0 : i32
    %21 = arith.cmpi ne, %20, %c0_i32_23 : i32
    scf.if %21 {
      %c0_24 = arith.constant 0 : index
      %c0_25 = arith.constant 0 : index
      %22 = vector.load %arg13[%c0_24, %c0_25] : memref<16x32xf32, #tpu.memory_space<vmem>>, vector<16x32xf32>
      %c0_26 = arith.constant 0 : index
      %c0_27 = arith.constant 0 : index
      %23 = vector.load %arg7[%c0_26, %c0_27] : memref<1x32xf32, #tpu.memory_space<vmem>>, vector<1x32xf32>
      %24 = vector.broadcast %23 : vector<1x32xf32> to vector<16x32xf32>
      %25 = arith.addf %22, %24 : vector<16x32xf32>
      %c0_28 = arith.constant 0 : index
      %c0_29 = arith.constant 0 : index
      %26 = vector.load %arg10[%c0_28, %c0_29] : memref<16x32xf32, #tpu.memory_space<vmem>>, vector<16x32xf32>
      tpu.vector_store %arg10[%c0_28, %c0_29], %25 {strides = array<i32>} : memref<16x32xf32, #tpu.memory_space<vmem>>, vector<16x32xf32>,
      %c0_30 = arith.constant 0 : index
      %c0_31 = arith.constant 0 : index
      %27 = vector.load %arg14[%c0_30, %c0_31] : memref<16x32xf32, #tpu.memory_space<vmem>>, vector<16x32xf32>
      %c0_32 = arith.constant 0 : index
      %c0_33 = arith.constant 0 : index
      %28 = vector.load %arg8[%c0_32, %c0_33] : memref<1x32xf32, #tpu.memory_space<vmem>>, vector<1x32xf32>
      %29 = vector.broadcast %28 : vector<1x32xf32> to vector<16x32xf32>
      %30 = arith.addf %27, %29 : vector<16x32xf32>
      %c0_34 = arith.constant 0 : index
      %c0_35 = arith.constant 0 : index
      %31 = vector.load %arg11[%c0_34, %c0_35] : memref<16x32xf32, #tpu.memory_space<vmem>>, vector<16x32xf32>
      tpu.vector_store %arg11[%c0_34, %c0_35], %30 {strides = array<i32>} : memref<16x32xf32, #tpu.memory_space<vmem>>, vector<16x32xf32>,
      %c0_36 = arith.constant 0 : index
      %c0_37 = arith.constant 0 : index
      %32 = vector.load %arg15[%c0_36, %c0_37] : memref<16x32xf32, #tpu.memory_space<vmem>>, vector<16x32xf32>
      %c0_38 = arith.constant 0 : index
      %c0_39 = arith.constant 0 : index
      %33 = vector.load %arg9[%c0_38, %c0_39] : memref<1x32xf32, #tpu.memory_space<vmem>>, vector<1x32xf32>
      %34 = vector.broadcast %33 : vector<1x32xf32> to vector<16x32xf32>
      %35 = arith.addf %32, %34 : vector<16x32xf32>
      %c0_40 = arith.constant 0 : index
      %c0_41 = arith.constant 0 : index
      %36 = vector.load %arg12[%c0_40, %c0_41] : memref<16x32xf32, #tpu.memory_space<vmem>>, vector<16x32xf32>
      tpu.vector_store %arg12[%c0_40, %c0_41], %35 {strides = array<i32>} : memref<16x32xf32, #tpu.memory_space<vmem>>, vector<16x32xf32>,
    } else {
    }
    return
  }
  func.func @transform_0(%arg0: i32, %arg1: i32, %arg2: i32) -> (i32, i32) {
    %c0_i32 = arith.constant 0 : i32
    return %arg0, %arg2 : i32, i32
  }
  func.func @transform_1(%arg0: i32, %arg1: i32, %arg2: i32) -> (i32, i32) {
    %c0_i32 = arith.constant 0 : i32
    return %arg2, %arg1 : i32, i32
  }
  func.func @transform_2(%arg0: i32, %arg1: i32, %arg2: i32) -> (i32, i32) {
    %c0_i32 = arith.constant 0 : i32
    return %arg2, %arg1 : i32, i32
  }
  func.func @transform_3(%arg0: i32, %arg1: i32, %arg2: i32) -> (i32, i32) {
    %c0_i32 = arith.constant 0 : i32
    return %arg2, %arg1 : i32, i32
  }
  func.func @transform_4(%arg0: i32, %arg1: i32, %arg2: i32) -> (i32, i32) {
    %c0_i32 = arith.constant 0 : i32
    %c0_i32_0 = arith.constant 0 : i32
    return %c0_i32, %arg1 : i32, i32
  }
  func.func @transform_5(%arg0: i32, %arg1: i32, %arg2: i32) -> (i32, i32) {
    %c0_i32 = arith.constant 0 : i32
    %c0_i32_0 = arith.constant 0 : i32
    return %c0_i32, %arg1 : i32, i32
  }
  func.func @transform_6(%arg0: i32, %arg1: i32, %arg2: i32) -> (i32, i32) {
    %c0_i32 = arith.constant 0 : i32
    %c0_i32_0 = arith.constant 0 : i32
    return %c0_i32, %arg1 : i32, i32
  }
  func.func @transform_7(%arg0: i32, %arg1: i32, %arg2: i32) -> (i32, i32) {
    %c0_i32 = arith.constant 0 : i32
    return %arg0, %arg1 : i32, i32
  }
  func.func @transform_8(%arg0: i32, %arg1: i32, %arg2: i32) -> (i32, i32) {
    %c0_i32 = arith.constant 0 : i32
    return %arg0, %arg1 : i32, i32
  }
  func.func @transform_9(%arg0: i32, %arg1: i32, %arg2: i32) -> (i32, i32) {
    %c0_i32 = arith.constant 0 : i32
    return %arg0, %arg1 : i32, i32
  }
}

module attributes {stable_mosaic.version = 11 : i64} {
  func.func @_flash_attn_kernel(%arg0: i32, %arg1: i32, %arg2: i32, %arg3: memref<1x8x32xf32, #tpu.memory_space<vmem>>, %arg4: memref<1x8x32xf32, #tpu.memory_space<vmem>>, %arg5: memref<1x8x32xf32, #tpu.memory_space<vmem>>, %arg6: memref<1x8x32xf32, #tpu.memory_space<vmem>>, %arg7: memref<4x8x1xf32, #tpu.memory_space<vmem>>, %arg8: memref<4x8x1xf32, #tpu.memory_space<vmem>>, %arg9: memref<4x8x8xf32, #tpu.memory_space<vmem>>) attributes {dimension_semantics = [#tpu.dimension_semantics<parallel>, #tpu.dimension_semantics<parallel>, #tpu.dimension_semantics<arbitrary>], iteration_bounds = array<i64: 2, 1, 1>, scalar_prefetch = 0 : i64, scratch_operands = 3 : i64, tpu.core_type = #tpu.core_type<tc>, window_params = [{transform_indices = @transform_0, window_bounds = array<i64: 1, 8, 32>}, {transform_indices = @transform_1, window_bounds = array<i64: 1, 8, 32>}, {transform_indices = @transform_2, window_bounds = array<i64: 1, 8, 32>}, {transform_indices = @transform_3, window_bounds = array<i64: 1, 8, 32>}]} {
    %c0_i32 = arith.constant 0 : i32
    %0 = arith.cmpi eq, %arg2, %c0_i32 : i32
    %1 = arith.extui %0 : i1 to i32
    %c0_i32_0 = arith.constant 0 : i32
    %2 = arith.cmpi ne, %1, %c0_i32_0 : i32
    scf.if %2 {
      %cst = arith.constant 0xFF800000 : f32
      %9 = vector.broadcast %cst : f32 to vector<4x8x1xf32>
      %c0 = arith.constant 0 : index
      %c0_3 = arith.constant 0 : index
      %c0_4 = arith.constant 0 : index
      %10 = vector.load %arg7[%c0, %c0_3, %c0_4] : memref<4x8x1xf32, #tpu.memory_space<vmem>>, vector<4x8x1xf32>
      tpu.vector_store %arg7[%c0, %c0_3, %c0_4], %9 {strides = array<i32>} : memref<4x8x1xf32, #tpu.memory_space<vmem>>, vector<4x8x1xf32>,
      %cst_5 = arith.constant 0.000000e+00 : f32
      %11 = vector.broadcast %cst_5 : f32 to vector<4x8x1xf32>
      %c0_6 = arith.constant 0 : index
      %c0_7 = arith.constant 0 : index
      %c0_8 = arith.constant 0 : index
      %12 = vector.load %arg8[%c0_6, %c0_7, %c0_8] : memref<4x8x1xf32, #tpu.memory_space<vmem>>, vector<4x8x1xf32>
      tpu.vector_store %arg8[%c0_6, %c0_7, %c0_8], %11 {strides = array<i32>} : memref<4x8x1xf32, #tpu.memory_space<vmem>>, vector<4x8x1xf32>,
      %cst_9 = arith.constant 0.000000e+00 : f32
      %13 = vector.broadcast %cst_9 : f32 to vector<4x8x8xf32>
      %c0_10 = arith.constant 0 : index
      %c0_11 = arith.constant 0 : index
      %c0_12 = arith.constant 0 : index
      %14 = vector.load %arg9[%c0_10, %c0_11, %c0_12] : memref<4x8x8xf32, #tpu.memory_space<vmem>>, vector<4x8x8xf32>
      tpu.vector_store %arg9[%c0_10, %c0_11, %c0_12], %13 {strides = array<i32>} : memref<4x8x8xf32, #tpu.memory_space<vmem>>, vector<4x8x8xf32>,
    } else {
    }
    %3 = arith.cmpi slt, %arg2, %arg1 : i32
    %4 = arith.extui %3 : i1 to i32
    %c0_i32_1 = arith.constant 0 : i32
    %5 = arith.cmpi ne, %4, %c0_i32_1 : i32
    scf.if %5 {
      %c0 = arith.constant 0 : index
      %c0_3 = arith.constant 0 : index
      %c0_4 = arith.constant 0 : index
      %9 = vector.load %arg3[%c0, %c0_3, %c0_4] : memref<1x8x32xf32, #tpu.memory_space<vmem>>, vector<1x8x8xf32>
      %10 = vector.shape_cast %9 : vector<1x8x8xf32> to vector<8x8xf32>
      %cst = arith.constant 0.353553385 : f32
      %11 = vector.broadcast %cst : f32 to vector<8x8xf32>
      %12 = arith.mulf %10, %11 : vector<8x8xf32>
      %c0_5 = arith.constant 0 : index
      %c0_6 = arith.constant 0 : index
      %c0_7 = arith.constant 0 : index
      %13 = vector.load %arg4[%c0_5, %c0_6, %c0_7] : memref<1x8x32xf32, #tpu.memory_space<vmem>>, vector<1x8x8xf32>
      %14 = vector.shape_cast %13 : vector<1x8x8xf32> to vector<8x8xf32>
      %c0_8 = arith.constant 0 : index
      %c0_9 = arith.constant 0 : index
      %c0_10 = arith.constant 0 : index
      %15 = vector.load %arg5[%c0_8, %c0_9, %c0_10] : memref<1x8x32xf32, #tpu.memory_space<vmem>>, vector<1x8x8xf32>
      %16 = vector.shape_cast %15 : vector<1x8x8xf32> to vector<8x8xf32>
      %17 = tpu.transpose %14, [1, 0] : vector<8x8xf32> -> vector<8x8xf32>
      %cst_11 = arith.constant dense<0.000000e+00> : vector<8x8xf32>
      %18 = tpu.matmul %12, %17, %cst_11 {dimension_numbers = #tpu.dot_dimension_numbers<[1], [0], [0], [1], [0, 0, 1, 1], [], []>} : vector<8x8xf32>, vector<8x8xf32>, vector<8x8xf32> -> vector<8x8xf32>
      %c0_12 = arith.constant 0 : index
      %c0_13 = arith.constant 0 : index
      %c0_14 = arith.constant 0 : index
      %19 = vector.load %arg7[%c0_12, %c0_13, %c0_14] : memref<4x8x1xf32, #tpu.memory_space<vmem>>, vector<1x8x1xf32>
      %20 = vector.shape_cast %19 : vector<1x8x1xf32> to vector<8x1xf32>
      %cst_15 = arith.constant dense<0xFF800000> : vector<8xf32>
      %21 = vector.multi_reduction <maximumf>, %18, %cst_15 [1] : vector<8x8xf32> to vector<8xf32>
      %22 = vector.shape_cast %21 : vector<8xf32> to vector<8x1xf32>
      %23 = arith.maximumf %20, %22 : vector<8x1xf32>
      %24 = arith.subf %20, %23 : vector<8x1xf32>
      %25 = math.exp %24 : vector<8x1xf32>
      %26 = vector.broadcast %23 : vector<8x1xf32> to vector<8x8xf32>
      %27 = arith.subf %18, %26 : vector<8x8xf32>
      %28 = math.exp %27 : vector<8x8xf32>
      %c0_16 = arith.constant 0 : index
      %c0_17 = arith.constant 0 : index
      %c0_18 = arith.constant 0 : index
      %29 = vector.load %arg8[%c0_16, %c0_17, %c0_18] : memref<4x8x1xf32, #tpu.memory_space<vmem>>, vector<1x8x1xf32>
      %30 = vector.shape_cast %29 : vector<1x8x1xf32> to vector<8x1xf32>
      %31 = arith.mulf %25, %30 : vector<8x1xf32>
      %cst_19 = arith.constant dense<0.000000e+00> : vector<8xf32>
      %32 = vector.multi_reduction <add>, %28, %cst_19 [1] : vector<8x8xf32> to vector<8xf32>
      %33 = vector.shape_cast %32 : vector<8xf32> to vector<8x1xf32>
      %34 = arith.addf %31, %33 : vector<8x1xf32>
      %c0_20 = arith.constant 0 : index
      %c0_21 = arith.constant 0 : index
      %c0_22 = arith.constant 0 : index
      %35 = vector.load %arg8[%c0_20, %c0_21, %c0_22] : memref<4x8x1xf32, #tpu.memory_space<vmem>>, vector<1x8x1xf32>
      %36 = vector.shape_cast %35 : vector<1x8x1xf32> to vector<8x1xf32>
      %37 = vector.shape_cast %34 : vector<8x1xf32> to vector<1x8x1xf32>
      tpu.vector_store %arg8[%c0_20, %c0_21, %c0_22], %37 {strides = array<i32>} : memref<4x8x1xf32, #tpu.memory_space<vmem>>, vector<1x8x1xf32>,
      %c0_23 = arith.constant 0 : index
      %c0_24 = arith.constant 0 : index
      %c0_25 = arith.constant 0 : index
      %38 = vector.load %arg9[%c0_23, %c0_24, %c0_25] : memref<4x8x8xf32, #tpu.memory_space<vmem>>, vector<1x8x8xf32>
      %39 = vector.shape_cast %38 : vector<1x8x8xf32> to vector<8x8xf32>
      %40 = vector.broadcast %25 : vector<8x1xf32> to vector<8x8xf32>
      %41 = arith.mulf %40, %39 : vector<8x8xf32>
      %cst_26 = arith.constant dense<0.000000e+00> : vector<8x8xf32>
      %42 = tpu.matmul %28, %16, %cst_26 {dimension_numbers = #tpu.dot_dimension_numbers<[1], [0], [0], [1], [0, 0, 1, 1], [], []>} : vector<8x8xf32>, vector<8x8xf32>, vector<8x8xf32> -> vector<8x8xf32>
      %43 = arith.addf %41, %42 : vector<8x8xf32>
      %c0_27 = arith.constant 0 : index
      %c0_28 = arith.constant 0 : index
      %c0_29 = arith.constant 0 : index
      %44 = vector.load %arg9[%c0_27, %c0_28, %c0_29] : memref<4x8x8xf32, #tpu.memory_space<vmem>>, vector<1x8x8xf32>
      %45 = vector.shape_cast %44 : vector<1x8x8xf32> to vector<8x8xf32>
      %46 = vector.shape_cast %43 : vector<8x8xf32> to vector<1x8x8xf32>
      tpu.vector_store %arg9[%c0_27, %c0_28, %c0_29], %46 {strides = array<i32>} : memref<4x8x8xf32, #tpu.memory_space<vmem>>, vector<1x8x8xf32>,
      %c0_30 = arith.constant 0 : index
      %c0_31 = arith.constant 0 : index
      %c0_32 = arith.constant 0 : index
      %47 = vector.load %arg7[%c0_30, %c0_31, %c0_32] : memref<4x8x1xf32, #tpu.memory_space<vmem>>, vector<1x8x1xf32>
      %48 = vector.shape_cast %47 : vector<1x8x1xf32> to vector<8x1xf32>
      %49 = vector.shape_cast %23 : vector<8x1xf32> to vector<1x8x1xf32>
      tpu.vector_store %arg7[%c0_30, %c0_31, %c0_32], %49 {strides = array<i32>} : memref<4x8x1xf32, #tpu.memory_space<vmem>>, vector<1x8x1xf32>,
      %c0_33 = arith.constant 0 : index
      %c0_34 = arith.constant 0 : index
      %c8 = arith.constant 8 : index
      %50 = vector.load %arg3[%c0_33, %c0_34, %c8] : memref<1x8x32xf32, #tpu.memory_space<vmem>>, vector<1x8x8xf32>
      %51 = vector.shape_cast %50 : vector<1x8x8xf32> to vector<8x8xf32>
      %cst_35 = arith.constant 0.353553385 : f32
      %52 = vector.broadcast %cst_35 : f32 to vector<8x8xf32>
      %53 = arith.mulf %51, %52 : vector<8x8xf32>
      %c0_36 = arith.constant 0 : index
      %c0_37 = arith.constant 0 : index
      %c8_38 = arith.constant 8 : index
      %54 = vector.load %arg4[%c0_36, %c0_37, %c8_38] : memref<1x8x32xf32, #tpu.memory_space<vmem>>, vector<1x8x8xf32>
      %55 = vector.shape_cast %54 : vector<1x8x8xf32> to vector<8x8xf32>
      %c0_39 = arith.constant 0 : index
      %c0_40 = arith.constant 0 : index
      %c8_41 = arith.constant 8 : index
      %56 = vector.load %arg5[%c0_39, %c0_40, %c8_41] : memref<1x8x32xf32, #tpu.memory_space<vmem>>, vector<1x8x8xf32>
      %57 = vector.shape_cast %56 : vector<1x8x8xf32> to vector<8x8xf32>
      %58 = tpu.transpose %55, [1, 0] : vector<8x8xf32> -> vector<8x8xf32>
      %cst_42 = arith.constant dense<0.000000e+00> : vector<8x8xf32>
      %59 = tpu.matmul %53, %58, %cst_42 {dimension_numbers = #tpu.dot_dimension_numbers<[1], [0], [0], [1], [0, 0, 1, 1], [], []>} : vector<8x8xf32>, vector<8x8xf32>, vector<8x8xf32> -> vector<8x8xf32>
      %c1 = arith.constant 1 : index
      %c0_43 = arith.constant 0 : index
      %c0_44 = arith.constant 0 : index
      %60 = vector.load %arg7[%c1, %c0_43, %c0_44] : memref<4x8x1xf32, #tpu.memory_space<vmem>>, vector<1x8x1xf32>
      %61 = vector.shape_cast %60 : vector<1x8x1xf32> to vector<8x1xf32>
      %cst_45 = arith.constant dense<0xFF800000> : vector<8xf32>
      %62 = vector.multi_reduction <maximumf>, %59, %cst_45 [1] : vector<8x8xf32> to vector<8xf32>
      %63 = vector.shape_cast %62 : vector<8xf32> to vector<8x1xf32>
      %64 = arith.maximumf %61, %63 : vector<8x1xf32>
      %65 = arith.subf %61, %64 : vector<8x1xf32>
      %66 = math.exp %65 : vector<8x1xf32>
      %67 = vector.broadcast %64 : vector<8x1xf32> to vector<8x8xf32>
      %68 = arith.subf %59, %67 : vector<8x8xf32>
      %69 = math.exp %68 : vector<8x8xf32>
      %c1_46 = arith.constant 1 : index
      %c0_47 = arith.constant 0 : index
      %c0_48 = arith.constant 0 : index
      %70 = vector.load %arg8[%c1_46, %c0_47, %c0_48] : memref<4x8x1xf32, #tpu.memory_space<vmem>>, vector<1x8x1xf32>
      %71 = vector.shape_cast %70 : vector<1x8x1xf32> to vector<8x1xf32>
      %72 = arith.mulf %66, %71 : vector<8x1xf32>
      %cst_49 = arith.constant dense<0.000000e+00> : vector<8xf32>
      %73 = vector.multi_reduction <add>, %69, %cst_49 [1] : vector<8x8xf32> to vector<8xf32>
      %74 = vector.shape_cast %73 : vector<8xf32> to vector<8x1xf32>
      %75 = arith.addf %72, %74 : vector<8x1xf32>
      %c1_50 = arith.constant 1 : index
      %c0_51 = arith.constant 0 : index
      %c0_52 = arith.constant 0 : index
      %76 = vector.load %arg8[%c1_50, %c0_51, %c0_52] : memref<4x8x1xf32, #tpu.memory_space<vmem>>, vector<1x8x1xf32>
      %77 = vector.shape_cast %76 : vector<1x8x1xf32> to vector<8x1xf32>
      %78 = vector.shape_cast %75 : vector<8x1xf32> to vector<1x8x1xf32>
      tpu.vector_store %arg8[%c1_50, %c0_51, %c0_52], %78 {strides = array<i32>} : memref<4x8x1xf32, #tpu.memory_space<vmem>>, vector<1x8x1xf32>,
      %c1_53 = arith.constant 1 : index
      %c0_54 = arith.constant 0 : index
      %c0_55 = arith.constant 0 : index
      %79 = vector.load %arg9[%c1_53, %c0_54, %c0_55] : memref<4x8x8xf32, #tpu.memory_space<vmem>>, vector<1x8x8xf32>
      %80 = vector.shape_cast %79 : vector<1x8x8xf32> to vector<8x8xf32>
      %81 = vector.broadcast %66 : vector<8x1xf32> to vector<8x8xf32>
      %82 = arith.mulf %81, %80 : vector<8x8xf32>
      %cst_56 = arith.constant dense<0.000000e+00> : vector<8x8xf32>
      %83 = tpu.matmul %69, %57, %cst_56 {dimension_numbers = #tpu.dot_dimension_numbers<[1], [0], [0], [1], [0, 0, 1, 1], [], []>} : vector<8x8xf32>, vector<8x8xf32>, vector<8x8xf32> -> vector<8x8xf32>
      %84 = arith.addf %82, %83 : vector<8x8xf32>
      %c1_57 = arith.constant 1 : index
      %c0_58 = arith.constant 0 : index
      %c0_59 = arith.constant 0 : index
      %85 = vector.load %arg9[%c1_57, %c0_58, %c0_59] : memref<4x8x8xf32, #tpu.memory_space<vmem>>, vector<1x8x8xf32>
      %86 = vector.shape_cast %85 : vector<1x8x8xf32> to vector<8x8xf32>
      %87 = vector.shape_cast %84 : vector<8x8xf32> to vector<1x8x8xf32>
      tpu.vector_store %arg9[%c1_57, %c0_58, %c0_59], %87 {strides = array<i32>} : memref<4x8x8xf32, #tpu.memory_space<vmem>>, vector<1x8x8xf32>,
      %c1_60 = arith.constant 1 : index
      %c0_61 = arith.constant 0 : index
      %c0_62 = arith.constant 0 : index
      %88 = vector.load %arg7[%c1_60, %c0_61, %c0_62] : memref<4x8x1xf32, #tpu.memory_space<vmem>>, vector<1x8x1xf32>
      %89 = vector.shape_cast %88 : vector<1x8x1xf32> to vector<8x1xf32>
      %90 = vector.shape_cast %64 : vector<8x1xf32> to vector<1x8x1xf32>
      tpu.vector_store %arg7[%c1_60, %c0_61, %c0_62], %90 {strides = array<i32>} : memref<4x8x1xf32, #tpu.memory_space<vmem>>, vector<1x8x1xf32>,
      %c0_63 = arith.constant 0 : index
      %c0_64 = arith.constant 0 : index
      %c16 = arith.constant 16 : index
      %91 = vector.load %arg3[%c0_63, %c0_64, %c16] : memref<1x8x32xf32, #tpu.memory_space<vmem>>, vector<1x8x8xf32>
      %92 = vector.shape_cast %91 : vector<1x8x8xf32> to vector<8x8xf32>
      %cst_65 = arith.constant 0.353553385 : f32
      %93 = vector.broadcast %cst_65 : f32 to vector<8x8xf32>
      %94 = arith.mulf %92, %93 : vector<8x8xf32>
      %c0_66 = arith.constant 0 : index
      %c0_67 = arith.constant 0 : index
      %c16_68 = arith.constant 16 : index
      %95 = vector.load %arg4[%c0_66, %c0_67, %c16_68] : memref<1x8x32xf32, #tpu.memory_space<vmem>>, vector<1x8x8xf32>
      %96 = vector.shape_cast %95 : vector<1x8x8xf32> to vector<8x8xf32>
      %c0_69 = arith.constant 0 : index
      %c0_70 = arith.constant 0 : index
      %c16_71 = arith.constant 16 : index
      %97 = vector.load %arg5[%c0_69, %c0_70, %c16_71] : memref<1x8x32xf32, #tpu.memory_space<vmem>>, vector<1x8x8xf32>
      %98 = vector.shape_cast %97 : vector<1x8x8xf32> to vector<8x8xf32>
      %99 = tpu.transpose %96, [1, 0] : vector<8x8xf32> -> vector<8x8xf32>
      %cst_72 = arith.constant dense<0.000000e+00> : vector<8x8xf32>
      %100 = tpu.matmul %94, %99, %cst_72 {dimension_numbers = #tpu.dot_dimension_numbers<[1], [0], [0], [1], [0, 0, 1, 1], [], []>} : vector<8x8xf32>, vector<8x8xf32>, vector<8x8xf32> -> vector<8x8xf32>
      %c2 = arith.constant 2 : index
      %c0_73 = arith.constant 0 : index
      %c0_74 = arith.constant 0 : index
      %101 = vector.load %arg7[%c2, %c0_73, %c0_74] : memref<4x8x1xf32, #tpu.memory_space<vmem>>, vector<1x8x1xf32>
      %102 = vector.shape_cast %101 : vector<1x8x1xf32> to vector<8x1xf32>
      %cst_75 = arith.constant dense<0xFF800000> : vector<8xf32>
      %103 = vector.multi_reduction <maximumf>, %100, %cst_75 [1] : vector<8x8xf32> to vector<8xf32>
      %104 = vector.shape_cast %103 : vector<8xf32> to vector<8x1xf32>
      %105 = arith.maximumf %102, %104 : vector<8x1xf32>
      %106 = arith.subf %102, %105 : vector<8x1xf32>
      %107 = math.exp %106 : vector<8x1xf32>
      %108 = vector.broadcast %105 : vector<8x1xf32> to vector<8x8xf32>
      %109 = arith.subf %100, %108 : vector<8x8xf32>
      %110 = math.exp %109 : vector<8x8xf32>
      %c2_76 = arith.constant 2 : index
      %c0_77 = arith.constant 0 : index
      %c0_78 = arith.constant 0 : index
      %111 = vector.load %arg8[%c2_76, %c0_77, %c0_78] : memref<4x8x1xf32, #tpu.memory_space<vmem>>, vector<1x8x1xf32>
      %112 = vector.shape_cast %111 : vector<1x8x1xf32> to vector<8x1xf32>
      %113 = arith.mulf %107, %112 : vector<8x1xf32>
      %cst_79 = arith.constant dense<0.000000e+00> : vector<8xf32>
      %114 = vector.multi_reduction <add>, %110, %cst_79 [1] : vector<8x8xf32> to vector<8xf32>
      %115 = vector.shape_cast %114 : vector<8xf32> to vector<8x1xf32>
      %116 = arith.addf %113, %115 : vector<8x1xf32>
      %c2_80 = arith.constant 2 : index
      %c0_81 = arith.constant 0 : index
      %c0_82 = arith.constant 0 : index
      %117 = vector.load %arg8[%c2_80, %c0_81, %c0_82] : memref<4x8x1xf32, #tpu.memory_space<vmem>>, vector<1x8x1xf32>
      %118 = vector.shape_cast %117 : vector<1x8x1xf32> to vector<8x1xf32>
      %119 = vector.shape_cast %116 : vector<8x1xf32> to vector<1x8x1xf32>
      tpu.vector_store %arg8[%c2_80, %c0_81, %c0_82], %119 {strides = array<i32>} : memref<4x8x1xf32, #tpu.memory_space<vmem>>, vector<1x8x1xf32>,
      %c2_83 = arith.constant 2 : index
      %c0_84 = arith.constant 0 : index
      %c0_85 = arith.constant 0 : index
      %120 = vector.load %arg9[%c2_83, %c0_84, %c0_85] : memref<4x8x8xf32, #tpu.memory_space<vmem>>, vector<1x8x8xf32>
      %121 = vector.shape_cast %120 : vector<1x8x8xf32> to vector<8x8xf32>
      %122 = vector.broadcast %107 : vector<8x1xf32> to vector<8x8xf32>
      %123 = arith.mulf %122, %121 : vector<8x8xf32>
      %cst_86 = arith.constant dense<0.000000e+00> : vector<8x8xf32>
      %124 = tpu.matmul %110, %98, %cst_86 {dimension_numbers = #tpu.dot_dimension_numbers<[1], [0], [0], [1], [0, 0, 1, 1], [], []>} : vector<8x8xf32>, vector<8x8xf32>, vector<8x8xf32> -> vector<8x8xf32>
      %125 = arith.addf %123, %124 : vector<8x8xf32>
      %c2_87 = arith.constant 2 : index
      %c0_88 = arith.constant 0 : index
      %c0_89 = arith.constant 0 : index
      %126 = vector.load %arg9[%c2_87, %c0_88, %c0_89] : memref<4x8x8xf32, #tpu.memory_space<vmem>>, vector<1x8x8xf32>
      %127 = vector.shape_cast %126 : vector<1x8x8xf32> to vector<8x8xf32>
      %128 = vector.shape_cast %125 : vector<8x8xf32> to vector<1x8x8xf32>
      tpu.vector_store %arg9[%c2_87, %c0_88, %c0_89], %128 {strides = array<i32>} : memref<4x8x8xf32, #tpu.memory_space<vmem>>, vector<1x8x8xf32>,
      %c2_90 = arith.constant 2 : index
      %c0_91 = arith.constant 0 : index
      %c0_92 = arith.constant 0 : index
      %129 = vector.load %arg7[%c2_90, %c0_91, %c0_92] : memref<4x8x1xf32, #tpu.memory_space<vmem>>, vector<1x8x1xf32>
      %130 = vector.shape_cast %129 : vector<1x8x1xf32> to vector<8x1xf32>
      %131 = vector.shape_cast %105 : vector<8x1xf32> to vector<1x8x1xf32>
      tpu.vector_store %arg7[%c2_90, %c0_91, %c0_92], %131 {strides = array<i32>} : memref<4x8x1xf32, #tpu.memory_space<vmem>>, vector<1x8x1xf32>,
      %c0_93 = arith.constant 0 : index
      %c0_94 = arith.constant 0 : index
      %c24 = arith.constant 24 : index
      %132 = vector.load %arg3[%c0_93, %c0_94, %c24] : memref<1x8x32xf32, #tpu.memory_space<vmem>>, vector<1x8x8xf32>
      %133 = vector.shape_cast %132 : vector<1x8x8xf32> to vector<8x8xf32>
      %cst_95 = arith.constant 0.353553385 : f32
      %134 = vector.broadcast %cst_95 : f32 to vector<8x8xf32>
      %135 = arith.mulf %133, %134 : vector<8x8xf32>
      %c0_96 = arith.constant 0 : index
      %c0_97 = arith.constant 0 : index
      %c24_98 = arith.constant 24 : index
      %136 = vector.load %arg4[%c0_96, %c0_97, %c24_98] : memref<1x8x32xf32, #tpu.memory_space<vmem>>, vector<1x8x8xf32>
      %137 = vector.shape_cast %136 : vector<1x8x8xf32> to vector<8x8xf32>
      %c0_99 = arith.constant 0 : index
      %c0_100 = arith.constant 0 : index
      %c24_101 = arith.constant 24 : index
      %138 = vector.load %arg5[%c0_99, %c0_100, %c24_101] : memref<1x8x32xf32, #tpu.memory_space<vmem>>, vector<1x8x8xf32>
      %139 = vector.shape_cast %138 : vector<1x8x8xf32> to vector<8x8xf32>
      %140 = tpu.transpose %137, [1, 0] : vector<8x8xf32> -> vector<8x8xf32>
      %cst_102 = arith.constant dense<0.000000e+00> : vector<8x8xf32>
      %141 = tpu.matmul %135, %140, %cst_102 {dimension_numbers = #tpu.dot_dimension_numbers<[1], [0], [0], [1], [0, 0, 1, 1], [], []>} : vector<8x8xf32>, vector<8x8xf32>, vector<8x8xf32> -> vector<8x8xf32>
      %c3 = arith.constant 3 : index
      %c0_103 = arith.constant 0 : index
      %c0_104 = arith.constant 0 : index
      %142 = vector.load %arg7[%c3, %c0_103, %c0_104] : memref<4x8x1xf32, #tpu.memory_space<vmem>>, vector<1x8x1xf32>
      %143 = vector.shape_cast %142 : vector<1x8x1xf32> to vector<8x1xf32>
      %cst_105 = arith.constant dense<0xFF800000> : vector<8xf32>
      %144 = vector.multi_reduction <maximumf>, %141, %cst_105 [1] : vector<8x8xf32> to vector<8xf32>
      %145 = vector.shape_cast %144 : vector<8xf32> to vector<8x1xf32>
      %146 = arith.maximumf %143, %145 : vector<8x1xf32>
      %147 = arith.subf %143, %146 : vector<8x1xf32>
      %148 = math.exp %147 : vector<8x1xf32>
      %149 = vector.broadcast %146 : vector<8x1xf32> to vector<8x8xf32>
      %150 = arith.subf %141, %149 : vector<8x8xf32>
      %151 = math.exp %150 : vector<8x8xf32>
      %c3_106 = arith.constant 3 : index
      %c0_107 = arith.constant 0 : index
      %c0_108 = arith.constant 0 : index
      %152 = vector.load %arg8[%c3_106, %c0_107, %c0_108] : memref<4x8x1xf32, #tpu.memory_space<vmem>>, vector<1x8x1xf32>
      %153 = vector.shape_cast %152 : vector<1x8x1xf32> to vector<8x1xf32>
      %154 = arith.mulf %148, %153 : vector<8x1xf32>
      %cst_109 = arith.constant dense<0.000000e+00> : vector<8xf32>
      %155 = vector.multi_reduction <add>, %151, %cst_109 [1] : vector<8x8xf32> to vector<8xf32>
      %156 = vector.shape_cast %155 : vector<8xf32> to vector<8x1xf32>
      %157 = arith.addf %154, %156 : vector<8x1xf32>
      %c3_110 = arith.constant 3 : index
      %c0_111 = arith.constant 0 : index
      %c0_112 = arith.constant 0 : index
      %158 = vector.load %arg8[%c3_110, %c0_111, %c0_112] : memref<4x8x1xf32, #tpu.memory_space<vmem>>, vector<1x8x1xf32>
      %159 = vector.shape_cast %158 : vector<1x8x1xf32> to vector<8x1xf32>
      %160 = vector.shape_cast %157 : vector<8x1xf32> to vector<1x8x1xf32>
      tpu.vector_store %arg8[%c3_110, %c0_111, %c0_112], %160 {strides = array<i32>} : memref<4x8x1xf32, #tpu.memory_space<vmem>>, vector<1x8x1xf32>,
      %c3_113 = arith.constant 3 : index
      %c0_114 = arith.constant 0 : index
      %c0_115 = arith.constant 0 : index
      %161 = vector.load %arg9[%c3_113, %c0_114, %c0_115] : memref<4x8x8xf32, #tpu.memory_space<vmem>>, vector<1x8x8xf32>
      %162 = vector.shape_cast %161 : vector<1x8x8xf32> to vector<8x8xf32>
      %163 = vector.broadcast %148 : vector<8x1xf32> to vector<8x8xf32>
      %164 = arith.mulf %163, %162 : vector<8x8xf32>
      %cst_116 = arith.constant dense<0.000000e+00> : vector<8x8xf32>
      %165 = tpu.matmul %151, %139, %cst_116 {dimension_numbers = #tpu.dot_dimension_numbers<[1], [0], [0], [1], [0, 0, 1, 1], [], []>} : vector<8x8xf32>, vector<8x8xf32>, vector<8x8xf32> -> vector<8x8xf32>
      %166 = arith.addf %164, %165 : vector<8x8xf32>
      %c3_117 = arith.constant 3 : index
      %c0_118 = arith.constant 0 : index
      %c0_119 = arith.constant 0 : index
      %167 = vector.load %arg9[%c3_117, %c0_118, %c0_119] : memref<4x8x8xf32, #tpu.memory_space<vmem>>, vector<1x8x8xf32>
      %168 = vector.shape_cast %167 : vector<1x8x8xf32> to vector<8x8xf32>
      %169 = vector.shape_cast %166 : vector<8x8xf32> to vector<1x8x8xf32>
      tpu.vector_store %arg9[%c3_117, %c0_118, %c0_119], %169 {strides = array<i32>} : memref<4x8x8xf32, #tpu.memory_space<vmem>>, vector<1x8x8xf32>,
      %c3_120 = arith.constant 3 : index
      %c0_121 = arith.constant 0 : index
      %c0_122 = arith.constant 0 : index
      %170 = vector.load %arg7[%c3_120, %c0_121, %c0_122] : memref<4x8x1xf32, #tpu.memory_space<vmem>>, vector<1x8x1xf32>
      %171 = vector.shape_cast %170 : vector<1x8x1xf32> to vector<8x1xf32>
      %172 = vector.shape_cast %146 : vector<8x1xf32> to vector<1x8x1xf32>
      tpu.vector_store %arg7[%c3_120, %c0_121, %c0_122], %172 {strides = array<i32>} : memref<4x8x1xf32, #tpu.memory_space<vmem>>, vector<1x8x1xf32>,
    } else {
    }
    %6 = arith.cmpi eq, %arg2, %arg1 : i32
    %7 = arith.extui %6 : i1 to i32
    %c0_i32_2 = arith.constant 0 : i32
    %8 = arith.cmpi ne, %7, %c0_i32_2 : i32
    scf.if %8 {
      %9 = tpu.iota {dimensions = array<i32: 0>} : vector<8x8xi32>
      %10 = tpu.iota {dimensions = array<i32: 1>} : vector<8x8xi32>
      %11 = arith.cmpi sgt, %10, %9 : vector<8x8xi32>
      %c0 = arith.constant 0 : index
      %c0_3 = arith.constant 0 : index
      %c0_4 = arith.constant 0 : index
      %12 = vector.load %arg3[%c0, %c0_3, %c0_4] : memref<1x8x32xf32, #tpu.memory_space<vmem>>, vector<1x8x8xf32>
      %13 = vector.shape_cast %12 : vector<1x8x8xf32> to vector<8x8xf32>
      %cst = arith.constant 0.353553385 : f32
      %14 = vector.broadcast %cst : f32 to vector<8x8xf32>
      %15 = arith.mulf %13, %14 : vector<8x8xf32>
      %c0_5 = arith.constant 0 : index
      %c0_6 = arith.constant 0 : index
      %c0_7 = arith.constant 0 : index
      %16 = vector.load %arg4[%c0_5, %c0_6, %c0_7] : memref<1x8x32xf32, #tpu.memory_space<vmem>>, vector<1x8x8xf32>
      %17 = vector.shape_cast %16 : vector<1x8x8xf32> to vector<8x8xf32>
      %c0_8 = arith.constant 0 : index
      %c0_9 = arith.constant 0 : index
      %c0_10 = arith.constant 0 : index
      %18 = vector.load %arg5[%c0_8, %c0_9, %c0_10] : memref<1x8x32xf32, #tpu.memory_space<vmem>>, vector<1x8x8xf32>
      %19 = vector.shape_cast %18 : vector<1x8x8xf32> to vector<8x8xf32>
      %20 = tpu.transpose %17, [1, 0] : vector<8x8xf32> -> vector<8x8xf32>
      %cst_11 = arith.constant dense<0.000000e+00> : vector<8x8xf32>
      %21 = tpu.matmul %15, %20, %cst_11 {dimension_numbers = #tpu.dot_dimension_numbers<[1], [0], [0], [1], [0, 0, 1, 1], [], []>} : vector<8x8xf32>, vector<8x8xf32>, vector<8x8xf32> -> vector<8x8xf32>
      %cst_12 = arith.constant 0xFF800000 : f32
      %22 = vector.broadcast %cst_12 : f32 to vector<8x8xf32>
      %23 = arith.select %11, %22, %21 : vector<8x8xi1>, vector<8x8xf32>
      %c0_13 = arith.constant 0 : index
      %c0_14 = arith.constant 0 : index
      %c0_15 = arith.constant 0 : index
      %24 = vector.load %arg7[%c0_13, %c0_14, %c0_15] : memref<4x8x1xf32, #tpu.memory_space<vmem>>, vector<1x8x1xf32>
      %25 = vector.shape_cast %24 : vector<1x8x1xf32> to vector<8x1xf32>
      %cst_16 = arith.constant dense<0xFF800000> : vector<8xf32>
      %26 = vector.multi_reduction <maximumf>, %23, %cst_16 [1] : vector<8x8xf32> to vector<8xf32>
      %27 = vector.shape_cast %26 : vector<8xf32> to vector<8x1xf32>
      %28 = arith.maximumf %25, %27 : vector<8x1xf32>
      %29 = arith.subf %25, %28 : vector<8x1xf32>
      %30 = math.exp %29 : vector<8x1xf32>
      %31 = vector.broadcast %28 : vector<8x1xf32> to vector<8x8xf32>
      %32 = arith.subf %23, %31 : vector<8x8xf32>
      %33 = math.exp %32 : vector<8x8xf32>
      %c0_17 = arith.constant 0 : index
      %c0_18 = arith.constant 0 : index
      %c0_19 = arith.constant 0 : index
      %34 = vector.load %arg8[%c0_17, %c0_18, %c0_19] : memref<4x8x1xf32, #tpu.memory_space<vmem>>, vector<1x8x1xf32>
      %35 = vector.shape_cast %34 : vector<1x8x1xf32> to vector<8x1xf32>
      %36 = arith.mulf %30, %35 : vector<8x1xf32>
      %cst_20 = arith.constant dense<0.000000e+00> : vector<8xf32>
      %37 = vector.multi_reduction <add>, %33, %cst_20 [1] : vector<8x8xf32> to vector<8xf32>
      %38 = vector.shape_cast %37 : vector<8xf32> to vector<8x1xf32>
      %39 = arith.addf %36, %38 : vector<8x1xf32>
      %c0_21 = arith.constant 0 : index
      %c0_22 = arith.constant 0 : index
      %c0_23 = arith.constant 0 : index
      %40 = vector.load %arg8[%c0_21, %c0_22, %c0_23] : memref<4x8x1xf32, #tpu.memory_space<vmem>>, vector<1x8x1xf32>
      %41 = vector.shape_cast %40 : vector<1x8x1xf32> to vector<8x1xf32>
      %42 = vector.shape_cast %39 : vector<8x1xf32> to vector<1x8x1xf32>
      tpu.vector_store %arg8[%c0_21, %c0_22, %c0_23], %42 {strides = array<i32>} : memref<4x8x1xf32, #tpu.memory_space<vmem>>, vector<1x8x1xf32>,
      %c0_24 = arith.constant 0 : index
      %c0_25 = arith.constant 0 : index
      %c0_26 = arith.constant 0 : index
      %43 = vector.load %arg9[%c0_24, %c0_25, %c0_26] : memref<4x8x8xf32, #tpu.memory_space<vmem>>, vector<1x8x8xf32>
      %44 = vector.shape_cast %43 : vector<1x8x8xf32> to vector<8x8xf32>
      %45 = vector.broadcast %30 : vector<8x1xf32> to vector<8x8xf32>
      %46 = arith.mulf %45, %44 : vector<8x8xf32>
      %cst_27 = arith.constant dense<0.000000e+00> : vector<8x8xf32>
      %47 = tpu.matmul %33, %19, %cst_27 {dimension_numbers = #tpu.dot_dimension_numbers<[1], [0], [0], [1], [0, 0, 1, 1], [], []>} : vector<8x8xf32>, vector<8x8xf32>, vector<8x8xf32> -> vector<8x8xf32>
      %48 = arith.addf %46, %47 : vector<8x8xf32>
      %c0_28 = arith.constant 0 : index
      %c0_29 = arith.constant 0 : index
      %c0_30 = arith.constant 0 : index
      %49 = vector.load %arg9[%c0_28, %c0_29, %c0_30] : memref<4x8x8xf32, #tpu.memory_space<vmem>>, vector<1x8x8xf32>
      %50 = vector.shape_cast %49 : vector<1x8x8xf32> to vector<8x8xf32>
      %51 = vector.shape_cast %48 : vector<8x8xf32> to vector<1x8x8xf32>
      tpu.vector_store %arg9[%c0_28, %c0_29, %c0_30], %51 {strides = array<i32>} : memref<4x8x8xf32, #tpu.memory_space<vmem>>, vector<1x8x8xf32>,
      %c0_31 = arith.constant 0 : index
      %c0_32 = arith.constant 0 : index
      %c0_33 = arith.constant 0 : index
      %52 = vector.load %arg7[%c0_31, %c0_32, %c0_33] : memref<4x8x1xf32, #tpu.memory_space<vmem>>, vector<1x8x1xf32>
      %53 = vector.shape_cast %52 : vector<1x8x1xf32> to vector<8x1xf32>
      %54 = vector.shape_cast %28 : vector<8x1xf32> to vector<1x8x1xf32>
      tpu.vector_store %arg7[%c0_31, %c0_32, %c0_33], %54 {strides = array<i32>} : memref<4x8x1xf32, #tpu.memory_space<vmem>>, vector<1x8x1xf32>,
      %c0_34 = arith.constant 0 : index
      %c0_35 = arith.constant 0 : index
      %c8 = arith.constant 8 : index
      %55 = vector.load %arg3[%c0_34, %c0_35, %c8] : memref<1x8x32xf32, #tpu.memory_space<vmem>>, vector<1x8x8xf32>
      %56 = vector.shape_cast %55 : vector<1x8x8xf32> to vector<8x8xf32>
      %cst_36 = arith.constant 0.353553385 : f32
      %57 = vector.broadcast %cst_36 : f32 to vector<8x8xf32>
      %58 = arith.mulf %56, %57 : vector<8x8xf32>
      %c0_37 = arith.constant 0 : index
      %c0_38 = arith.constant 0 : index
      %c8_39 = arith.constant 8 : index
      %59 = vector.load %arg4[%c0_37, %c0_38, %c8_39] : memref<1x8x32xf32, #tpu.memory_space<vmem>>, vector<1x8x8xf32>
      %60 = vector.shape_cast %59 : vector<1x8x8xf32> to vector<8x8xf32>
      %c0_40 = arith.constant 0 : index
      %c0_41 = arith.constant 0 : index
      %c8_42 = arith.constant 8 : index
      %61 = vector.load %arg5[%c0_40, %c0_41, %c8_42] : memref<1x8x32xf32, #tpu.memory_space<vmem>>, vector<1x8x8xf32>
      %62 = vector.shape_cast %61 : vector<1x8x8xf32> to vector<8x8xf32>
      %63 = tpu.transpose %60, [1, 0] : vector<8x8xf32> -> vector<8x8xf32>
      %cst_43 = arith.constant dense<0.000000e+00> : vector<8x8xf32>
      %64 = tpu.matmul %58, %63, %cst_43 {dimension_numbers = #tpu.dot_dimension_numbers<[1], [0], [0], [1], [0, 0, 1, 1], [], []>} : vector<8x8xf32>, vector<8x8xf32>, vector<8x8xf32> -> vector<8x8xf32>
      %cst_44 = arith.constant 0xFF800000 : f32
      %65 = vector.broadcast %cst_44 : f32 to vector<8x8xf32>
      %66 = arith.select %11, %65, %64 : vector<8x8xi1>, vector<8x8xf32>
      %c1 = arith.constant 1 : index
      %c0_45 = arith.constant 0 : index
      %c0_46 = arith.constant 0 : index
      %67 = vector.load %arg7[%c1, %c0_45, %c0_46] : memref<4x8x1xf32, #tpu.memory_space<vmem>>, vector<1x8x1xf32>
      %68 = vector.shape_cast %67 : vector<1x8x1xf32> to vector<8x1xf32>
      %cst_47 = arith.constant dense<0xFF800000> : vector<8xf32>
      %69 = vector.multi_reduction <maximumf>, %66, %cst_47 [1] : vector<8x8xf32> to vector<8xf32>
      %70 = vector.shape_cast %69 : vector<8xf32> to vector<8x1xf32>
      %71 = arith.maximumf %68, %70 : vector<8x1xf32>
      %72 = arith.subf %68, %71 : vector<8x1xf32>
      %73 = math.exp %72 : vector<8x1xf32>
      %74 = vector.broadcast %71 : vector<8x1xf32> to vector<8x8xf32>
      %75 = arith.subf %66, %74 : vector<8x8xf32>
      %76 = math.exp %75 : vector<8x8xf32>
      %c1_48 = arith.constant 1 : index
      %c0_49 = arith.constant 0 : index
      %c0_50 = arith.constant 0 : index
      %77 = vector.load %arg8[%c1_48, %c0_49, %c0_50] : memref<4x8x1xf32, #tpu.memory_space<vmem>>, vector<1x8x1xf32>
      %78 = vector.shape_cast %77 : vector<1x8x1xf32> to vector<8x1xf32>
      %79 = arith.mulf %73, %78 : vector<8x1xf32>
      %cst_51 = arith.constant dense<0.000000e+00> : vector<8xf32>
      %80 = vector.multi_reduction <add>, %76, %cst_51 [1] : vector<8x8xf32> to vector<8xf32>
      %81 = vector.shape_cast %80 : vector<8xf32> to vector<8x1xf32>
      %82 = arith.addf %79, %81 : vector<8x1xf32>
      %c1_52 = arith.constant 1 : index
      %c0_53 = arith.constant 0 : index
      %c0_54 = arith.constant 0 : index
      %83 = vector.load %arg8[%c1_52, %c0_53, %c0_54] : memref<4x8x1xf32, #tpu.memory_space<vmem>>, vector<1x8x1xf32>
      %84 = vector.shape_cast %83 : vector<1x8x1xf32> to vector<8x1xf32>
      %85 = vector.shape_cast %82 : vector<8x1xf32> to vector<1x8x1xf32>
      tpu.vector_store %arg8[%c1_52, %c0_53, %c0_54], %85 {strides = array<i32>} : memref<4x8x1xf32, #tpu.memory_space<vmem>>, vector<1x8x1xf32>,
      %c1_55 = arith.constant 1 : index
      %c0_56 = arith.constant 0 : index
      %c0_57 = arith.constant 0 : index
      %86 = vector.load %arg9[%c1_55, %c0_56, %c0_57] : memref<4x8x8xf32, #tpu.memory_space<vmem>>, vector<1x8x8xf32>
      %87 = vector.shape_cast %86 : vector<1x8x8xf32> to vector<8x8xf32>
      %88 = vector.broadcast %73 : vector<8x1xf32> to vector<8x8xf32>
      %89 = arith.mulf %88, %87 : vector<8x8xf32>
      %cst_58 = arith.constant dense<0.000000e+00> : vector<8x8xf32>
      %90 = tpu.matmul %76, %62, %cst_58 {dimension_numbers = #tpu.dot_dimension_numbers<[1], [0], [0], [1], [0, 0, 1, 1], [], []>} : vector<8x8xf32>, vector<8x8xf32>, vector<8x8xf32> -> vector<8x8xf32>
      %91 = arith.addf %89, %90 : vector<8x8xf32>
      %c1_59 = arith.constant 1 : index
      %c0_60 = arith.constant 0 : index
      %c0_61 = arith.constant 0 : index
      %92 = vector.load %arg9[%c1_59, %c0_60, %c0_61] : memref<4x8x8xf32, #tpu.memory_space<vmem>>, vector<1x8x8xf32>
      %93 = vector.shape_cast %92 : vector<1x8x8xf32> to vector<8x8xf32>
      %94 = vector.shape_cast %91 : vector<8x8xf32> to vector<1x8x8xf32>
      tpu.vector_store %arg9[%c1_59, %c0_60, %c0_61], %94 {strides = array<i32>} : memref<4x8x8xf32, #tpu.memory_space<vmem>>, vector<1x8x8xf32>,
      %c1_62 = arith.constant 1 : index
      %c0_63 = arith.constant 0 : index
      %c0_64 = arith.constant 0 : index
      %95 = vector.load %arg7[%c1_62, %c0_63, %c0_64] : memref<4x8x1xf32, #tpu.memory_space<vmem>>, vector<1x8x1xf32>
      %96 = vector.shape_cast %95 : vector<1x8x1xf32> to vector<8x1xf32>
      %97 = vector.shape_cast %71 : vector<8x1xf32> to vector<1x8x1xf32>
      tpu.vector_store %arg7[%c1_62, %c0_63, %c0_64], %97 {strides = array<i32>} : memref<4x8x1xf32, #tpu.memory_space<vmem>>, vector<1x8x1xf32>,
      %c0_65 = arith.constant 0 : index
      %c0_66 = arith.constant 0 : index
      %c16 = arith.constant 16 : index
      %98 = vector.load %arg3[%c0_65, %c0_66, %c16] : memref<1x8x32xf32, #tpu.memory_space<vmem>>, vector<1x8x8xf32>
      %99 = vector.shape_cast %98 : vector<1x8x8xf32> to vector<8x8xf32>
      %cst_67 = arith.constant 0.353553385 : f32
      %100 = vector.broadcast %cst_67 : f32 to vector<8x8xf32>
      %101 = arith.mulf %99, %100 : vector<8x8xf32>
      %c0_68 = arith.constant 0 : index
      %c0_69 = arith.constant 0 : index
      %c16_70 = arith.constant 16 : index
      %102 = vector.load %arg4[%c0_68, %c0_69, %c16_70] : memref<1x8x32xf32, #tpu.memory_space<vmem>>, vector<1x8x8xf32>
      %103 = vector.shape_cast %102 : vector<1x8x8xf32> to vector<8x8xf32>
      %c0_71 = arith.constant 0 : index
      %c0_72 = arith.constant 0 : index
      %c16_73 = arith.constant 16 : index
      %104 = vector.load %arg5[%c0_71, %c0_72, %c16_73] : memref<1x8x32xf32, #tpu.memory_space<vmem>>, vector<1x8x8xf32>
      %105 = vector.shape_cast %104 : vector<1x8x8xf32> to vector<8x8xf32>
      %106 = tpu.transpose %103, [1, 0] : vector<8x8xf32> -> vector<8x8xf32>
      %cst_74 = arith.constant dense<0.000000e+00> : vector<8x8xf32>
      %107 = tpu.matmul %101, %106, %cst_74 {dimension_numbers = #tpu.dot_dimension_numbers<[1], [0], [0], [1], [0, 0, 1, 1], [], []>} : vector<8x8xf32>, vector<8x8xf32>, vector<8x8xf32> -> vector<8x8xf32>
      %cst_75 = arith.constant 0xFF800000 : f32
      %108 = vector.broadcast %cst_75 : f32 to vector<8x8xf32>
      %109 = arith.select %11, %108, %107 : vector<8x8xi1>, vector<8x8xf32>
      %c2 = arith.constant 2 : index
      %c0_76 = arith.constant 0 : index
      %c0_77 = arith.constant 0 : index
      %110 = vector.load %arg7[%c2, %c0_76, %c0_77] : memref<4x8x1xf32, #tpu.memory_space<vmem>>, vector<1x8x1xf32>
      %111 = vector.shape_cast %110 : vector<1x8x1xf32> to vector<8x1xf32>
      %cst_78 = arith.constant dense<0xFF800000> : vector<8xf32>
      %112 = vector.multi_reduction <maximumf>, %109, %cst_78 [1] : vector<8x8xf32> to vector<8xf32>
      %113 = vector.shape_cast %112 : vector<8xf32> to vector<8x1xf32>
      %114 = arith.maximumf %111, %113 : vector<8x1xf32>
      %115 = arith.subf %111, %114 : vector<8x1xf32>
      %116 = math.exp %115 : vector<8x1xf32>
      %117 = vector.broadcast %114 : vector<8x1xf32> to vector<8x8xf32>
      %118 = arith.subf %109, %117 : vector<8x8xf32>
      %119 = math.exp %118 : vector<8x8xf32>
      %c2_79 = arith.constant 2 : index
      %c0_80 = arith.constant 0 : index
      %c0_81 = arith.constant 0 : index
      %120 = vector.load %arg8[%c2_79, %c0_80, %c0_81] : memref<4x8x1xf32, #tpu.memory_space<vmem>>, vector<1x8x1xf32>
      %121 = vector.shape_cast %120 : vector<1x8x1xf32> to vector<8x1xf32>
      %122 = arith.mulf %116, %121 : vector<8x1xf32>
      %cst_82 = arith.constant dense<0.000000e+00> : vector<8xf32>
      %123 = vector.multi_reduction <add>, %119, %cst_82 [1] : vector<8x8xf32> to vector<8xf32>
      %124 = vector.shape_cast %123 : vector<8xf32> to vector<8x1xf32>
      %125 = arith.addf %122, %124 : vector<8x1xf32>
      %c2_83 = arith.constant 2 : index
      %c0_84 = arith.constant 0 : index
      %c0_85 = arith.constant 0 : index
      %126 = vector.load %arg8[%c2_83, %c0_84, %c0_85] : memref<4x8x1xf32, #tpu.memory_space<vmem>>, vector<1x8x1xf32>
      %127 = vector.shape_cast %126 : vector<1x8x1xf32> to vector<8x1xf32>
      %128 = vector.shape_cast %125 : vector<8x1xf32> to vector<1x8x1xf32>
      tpu.vector_store %arg8[%c2_83, %c0_84, %c0_85], %128 {strides = array<i32>} : memref<4x8x1xf32, #tpu.memory_space<vmem>>, vector<1x8x1xf32>,
      %c2_86 = arith.constant 2 : index
      %c0_87 = arith.constant 0 : index
      %c0_88 = arith.constant 0 : index
      %129 = vector.load %arg9[%c2_86, %c0_87, %c0_88] : memref<4x8x8xf32, #tpu.memory_space<vmem>>, vector<1x8x8xf32>
      %130 = vector.shape_cast %129 : vector<1x8x8xf32> to vector<8x8xf32>
      %131 = vector.broadcast %116 : vector<8x1xf32> to vector<8x8xf32>
      %132 = arith.mulf %131, %130 : vector<8x8xf32>
      %cst_89 = arith.constant dense<0.000000e+00> : vector<8x8xf32>
      %133 = tpu.matmul %119, %105, %cst_89 {dimension_numbers = #tpu.dot_dimension_numbers<[1], [0], [0], [1], [0, 0, 1, 1], [], []>} : vector<8x8xf32>, vector<8x8xf32>, vector<8x8xf32> -> vector<8x8xf32>
      %134 = arith.addf %132, %133 : vector<8x8xf32>
      %c2_90 = arith.constant 2 : index
      %c0_91 = arith.constant 0 : index
      %c0_92 = arith.constant 0 : index
      %135 = vector.load %arg9[%c2_90, %c0_91, %c0_92] : memref<4x8x8xf32, #tpu.memory_space<vmem>>, vector<1x8x8xf32>
      %136 = vector.shape_cast %135 : vector<1x8x8xf32> to vector<8x8xf32>
      %137 = vector.shape_cast %134 : vector<8x8xf32> to vector<1x8x8xf32>
      tpu.vector_store %arg9[%c2_90, %c0_91, %c0_92], %137 {strides = array<i32>} : memref<4x8x8xf32, #tpu.memory_space<vmem>>, vector<1x8x8xf32>,
      %c2_93 = arith.constant 2 : index
      %c0_94 = arith.constant 0 : index
      %c0_95 = arith.constant 0 : index
      %138 = vector.load %arg7[%c2_93, %c0_94, %c0_95] : memref<4x8x1xf32, #tpu.memory_space<vmem>>, vector<1x8x1xf32>
      %139 = vector.shape_cast %138 : vector<1x8x1xf32> to vector<8x1xf32>
      %140 = vector.shape_cast %114 : vector<8x1xf32> to vector<1x8x1xf32>
      tpu.vector_store %arg7[%c2_93, %c0_94, %c0_95], %140 {strides = array<i32>} : memref<4x8x1xf32, #tpu.memory_space<vmem>>, vector<1x8x1xf32>,
      %c0_96 = arith.constant 0 : index
      %c0_97 = arith.constant 0 : index
      %c24 = arith.constant 24 : index
      %141 = vector.load %arg3[%c0_96, %c0_97, %c24] : memref<1x8x32xf32, #tpu.memory_space<vmem>>, vector<1x8x8xf32>
      %142 = vector.shape_cast %141 : vector<1x8x8xf32> to vector<8x8xf32>
      %cst_98 = arith.constant 0.353553385 : f32
      %143 = vector.broadcast %cst_98 : f32 to vector<8x8xf32>
      %144 = arith.mulf %142, %143 : vector<8x8xf32>
      %c0_99 = arith.constant 0 : index
      %c0_100 = arith.constant 0 : index
      %c24_101 = arith.constant 24 : index
      %145 = vector.load %arg4[%c0_99, %c0_100, %c24_101] : memref<1x8x32xf32, #tpu.memory_space<vmem>>, vector<1x8x8xf32>
      %146 = vector.shape_cast %145 : vector<1x8x8xf32> to vector<8x8xf32>
      %c0_102 = arith.constant 0 : index
      %c0_103 = arith.constant 0 : index
      %c24_104 = arith.constant 24 : index
      %147 = vector.load %arg5[%c0_102, %c0_103, %c24_104] : memref<1x8x32xf32, #tpu.memory_space<vmem>>, vector<1x8x8xf32>
      %148 = vector.shape_cast %147 : vector<1x8x8xf32> to vector<8x8xf32>
      %149 = tpu.transpose %146, [1, 0] : vector<8x8xf32> -> vector<8x8xf32>
      %cst_105 = arith.constant dense<0.000000e+00> : vector<8x8xf32>
      %150 = tpu.matmul %144, %149, %cst_105 {dimension_numbers = #tpu.dot_dimension_numbers<[1], [0], [0], [1], [0, 0, 1, 1], [], []>} : vector<8x8xf32>, vector<8x8xf32>, vector<8x8xf32> -> vector<8x8xf32>
      %cst_106 = arith.constant 0xFF800000 : f32
      %151 = vector.broadcast %cst_106 : f32 to vector<8x8xf32>
      %152 = arith.select %11, %151, %150 : vector<8x8xi1>, vector<8x8xf32>
      %c3 = arith.constant 3 : index
      %c0_107 = arith.constant 0 : index
      %c0_108 = arith.constant 0 : index
      %153 = vector.load %arg7[%c3, %c0_107, %c0_108] : memref<4x8x1xf32, #tpu.memory_space<vmem>>, vector<1x8x1xf32>
      %154 = vector.shape_cast %153 : vector<1x8x1xf32> to vector<8x1xf32>
      %cst_109 = arith.constant dense<0xFF800000> : vector<8xf32>
      %155 = vector.multi_reduction <maximumf>, %152, %cst_109 [1] : vector<8x8xf32> to vector<8xf32>
      %156 = vector.shape_cast %155 : vector<8xf32> to vector<8x1xf32>
      %157 = arith.maximumf %154, %156 : vector<8x1xf32>
      %158 = arith.subf %154, %157 : vector<8x1xf32>
      %159 = math.exp %158 : vector<8x1xf32>
      %160 = vector.broadcast %157 : vector<8x1xf32> to vector<8x8xf32>
      %161 = arith.subf %152, %160 : vector<8x8xf32>
      %162 = math.exp %161 : vector<8x8xf32>
      %c3_110 = arith.constant 3 : index
      %c0_111 = arith.constant 0 : index
      %c0_112 = arith.constant 0 : index
      %163 = vector.load %arg8[%c3_110, %c0_111, %c0_112] : memref<4x8x1xf32, #tpu.memory_space<vmem>>, vector<1x8x1xf32>
      %164 = vector.shape_cast %163 : vector<1x8x1xf32> to vector<8x1xf32>
      %165 = arith.mulf %159, %164 : vector<8x1xf32>
      %cst_113 = arith.constant dense<0.000000e+00> : vector<8xf32>
      %166 = vector.multi_reduction <add>, %162, %cst_113 [1] : vector<8x8xf32> to vector<8xf32>
      %167 = vector.shape_cast %166 : vector<8xf32> to vector<8x1xf32>
      %168 = arith.addf %165, %167 : vector<8x1xf32>
      %c3_114 = arith.constant 3 : index
      %c0_115 = arith.constant 0 : index
      %c0_116 = arith.constant 0 : index
      %169 = vector.load %arg8[%c3_114, %c0_115, %c0_116] : memref<4x8x1xf32, #tpu.memory_space<vmem>>, vector<1x8x1xf32>
      %170 = vector.shape_cast %169 : vector<1x8x1xf32> to vector<8x1xf32>
      %171 = vector.shape_cast %168 : vector<8x1xf32> to vector<1x8x1xf32>
      tpu.vector_store %arg8[%c3_114, %c0_115, %c0_116], %171 {strides = array<i32>} : memref<4x8x1xf32, #tpu.memory_space<vmem>>, vector<1x8x1xf32>,
      %c3_117 = arith.constant 3 : index
      %c0_118 = arith.constant 0 : index
      %c0_119 = arith.constant 0 : index
      %172 = vector.load %arg9[%c3_117, %c0_118, %c0_119] : memref<4x8x8xf32, #tpu.memory_space<vmem>>, vector<1x8x8xf32>
      %173 = vector.shape_cast %172 : vector<1x8x8xf32> to vector<8x8xf32>
      %174 = vector.broadcast %159 : vector<8x1xf32> to vector<8x8xf32>
      %175 = arith.mulf %174, %173 : vector<8x8xf32>
      %cst_120 = arith.constant dense<0.000000e+00> : vector<8x8xf32>
      %176 = tpu.matmul %162, %148, %cst_120 {dimension_numbers = #tpu.dot_dimension_numbers<[1], [0], [0], [1], [0, 0, 1, 1], [], []>} : vector<8x8xf32>, vector<8x8xf32>, vector<8x8xf32> -> vector<8x8xf32>
      %177 = arith.addf %175, %176 : vector<8x8xf32>
      %c3_121 = arith.constant 3 : index
      %c0_122 = arith.constant 0 : index
      %c0_123 = arith.constant 0 : index
      %178 = vector.load %arg9[%c3_121, %c0_122, %c0_123] : memref<4x8x8xf32, #tpu.memory_space<vmem>>, vector<1x8x8xf32>
      %179 = vector.shape_cast %178 : vector<1x8x8xf32> to vector<8x8xf32>
      %180 = vector.shape_cast %177 : vector<8x8xf32> to vector<1x8x8xf32>
      tpu.vector_store %arg9[%c3_121, %c0_122, %c0_123], %180 {strides = array<i32>} : memref<4x8x8xf32, #tpu.memory_space<vmem>>, vector<1x8x8xf32>,
      %c3_124 = arith.constant 3 : index
      %c0_125 = arith.constant 0 : index
      %c0_126 = arith.constant 0 : index
      %181 = vector.load %arg7[%c3_124, %c0_125, %c0_126] : memref<4x8x1xf32, #tpu.memory_space<vmem>>, vector<1x8x1xf32>
      %182 = vector.shape_cast %181 : vector<1x8x1xf32> to vector<8x1xf32>
      %183 = vector.shape_cast %157 : vector<8x1xf32> to vector<1x8x1xf32>
      tpu.vector_store %arg7[%c3_124, %c0_125, %c0_126], %183 {strides = array<i32>} : memref<4x8x1xf32, #tpu.memory_space<vmem>>, vector<1x8x1xf32>,
      %c0_127 = arith.constant 0 : index
      %c0_128 = arith.constant 0 : index
      %c0_129 = arith.constant 0 : index
      %184 = vector.load %arg8[%c0_127, %c0_128, %c0_129] : memref<4x8x1xf32, #tpu.memory_space<vmem>>, vector<1x8x1xf32>
      %185 = vector.shape_cast %184 : vector<1x8x1xf32> to vector<8x1xf32>
      %186 = tpu.reciprocal %185 : vector<8x1xf32> -> vector<8x1xf32>
      %c0_130 = arith.constant 0 : index
      %c0_131 = arith.constant 0 : index
      %c0_132 = arith.constant 0 : index
      %187 = vector.load %arg9[%c0_130, %c0_131, %c0_132] : memref<4x8x8xf32, #tpu.memory_space<vmem>>, vector<1x8x8xf32>
      %188 = vector.shape_cast %187 : vector<1x8x8xf32> to vector<8x8xf32>
      %189 = vector.broadcast %186 : vector<8x1xf32> to vector<8x8xf32>
      %190 = arith.mulf %188, %189 : vector<8x8xf32>
      %c1_133 = arith.constant 1 : index
      %c0_134 = arith.constant 0 : index
      %c0_135 = arith.constant 0 : index
      %191 = vector.load %arg8[%c1_133, %c0_134, %c0_135] : memref<4x8x1xf32, #tpu.memory_space<vmem>>, vector<1x8x1xf32>
      %192 = vector.shape_cast %191 : vector<1x8x1xf32> to vector<8x1xf32>
      %193 = tpu.reciprocal %192 : vector<8x1xf32> -> vector<8x1xf32>
      %c1_136 = arith.constant 1 : index
      %c0_137 = arith.constant 0 : index
      %c0_138 = arith.constant 0 : index
      %194 = vector.load %arg9[%c1_136, %c0_137, %c0_138] : memref<4x8x8xf32, #tpu.memory_space<vmem>>, vector<1x8x8xf32>
      %195 = vector.shape_cast %194 : vector<1x8x8xf32> to vector<8x8xf32>
      %196 = vector.broadcast %193 : vector<8x1xf32> to vector<8x8xf32>
      %197 = arith.mulf %195, %196 : vector<8x8xf32>
      %c2_139 = arith.constant 2 : index
      %c0_140 = arith.constant 0 : index
      %c0_141 = arith.constant 0 : index
      %198 = vector.load %arg8[%c2_139, %c0_140, %c0_141] : memref<4x8x1xf32, #tpu.memory_space<vmem>>, vector<1x8x1xf32>
      %199 = vector.shape_cast %198 : vector<1x8x1xf32> to vector<8x1xf32>
      %200 = tpu.reciprocal %199 : vector<8x1xf32> -> vector<8x1xf32>
      %c2_142 = arith.constant 2 : index
      %c0_143 = arith.constant 0 : index
      %c0_144 = arith.constant 0 : index
      %201 = vector.load %arg9[%c2_142, %c0_143, %c0_144] : memref<4x8x8xf32, #tpu.memory_space<vmem>>, vector<1x8x8xf32>
      %202 = vector.shape_cast %201 : vector<1x8x8xf32> to vector<8x8xf32>
      %203 = vector.broadcast %200 : vector<8x1xf32> to vector<8x8xf32>
      %204 = arith.mulf %202, %203 : vector<8x8xf32>
      %c3_145 = arith.constant 3 : index
      %c0_146 = arith.constant 0 : index
      %c0_147 = arith.constant 0 : index
      %205 = vector.load %arg8[%c3_145, %c0_146, %c0_147] : memref<4x8x1xf32, #tpu.memory_space<vmem>>, vector<1x8x1xf32>
      %206 = vector.shape_cast %205 : vector<1x8x1xf32> to vector<8x1xf32>
      %207 = tpu.reciprocal %206 : vector<8x1xf32> -> vector<8x1xf32>
      %c3_148 = arith.constant 3 : index
      %c0_149 = arith.constant 0 : index
      %c0_150 = arith.constant 0 : index
      %208 = vector.load %arg9[%c3_148, %c0_149, %c0_150] : memref<4x8x8xf32, #tpu.memory_space<vmem>>, vector<1x8x8xf32>
      %209 = vector.shape_cast %208 : vector<1x8x8xf32> to vector<8x8xf32>
      %210 = vector.broadcast %207 : vector<8x1xf32> to vector<8x8xf32>
      %211 = arith.mulf %209, %210 : vector<8x8xf32>
      %212 = tpu.concatenate %190, %197, %204, %211 in 1 : vector<8x8xf32>, vector<8x8xf32>, vector<8x8xf32>, vector<8x8xf32> -> vector<8x32xf32>
      %c0_151 = arith.constant 0 : index
      %c0_152 = arith.constant 0 : index
      %c0_153 = arith.constant 0 : index
      %213 = vector.load %arg6[%c0_151, %c0_152, %c0_153] : memref<1x8x32xf32, #tpu.memory_space<vmem>>, vector<1x8x32xf32>
      %214 = vector.shape_cast %213 : vector<1x8x32xf32> to vector<8x32xf32>
      %215 = vector.shape_cast %212 : vector<8x32xf32> to vector<1x8x32xf32>
      tpu.vector_store %arg6[%c0_151, %c0_152, %c0_153], %215 {strides = array<i32>} : memref<1x8x32xf32, #tpu.memory_space<vmem>>, vector<1x8x32xf32>,
    } else {
    }
    return
  }
  func.func @transform_0(%arg0: i32, %arg1: i32, %arg2: i32) -> (i32, i32, i32) {
    %c0_i32 = arith.constant 0 : i32
    %c0_i32_0 = arith.constant 0 : i32
    return %arg0, %arg1, %c0_i32 : i32, i32, i32
  }
  func.func @transform_1(%arg0: i32, %arg1: i32, %arg2: i32) -> (i32, i32, i32) {
    %0 = arith.minsi %arg1, %arg2 : i32
    %c0_i32 = arith.constant 0 : i32
    %c0_i32_0 = arith.constant 0 : i32
    return %arg0, %0, %c0_i32 : i32, i32, i32
  }
  func.func @transform_2(%arg0: i32, %arg1: i32, %arg2: i32) -> (i32, i32, i32) {
    %0 = arith.minsi %arg1, %arg2 : i32
    %c0_i32 = arith.constant 0 : i32
    %c0_i32_0 = arith.constant 0 : i32
    return %arg0, %0, %c0_i32 : i32, i32, i32
  }
  func.func @transform_3(%arg0: i32, %arg1: i32, %arg2: i32) -> (i32, i32, i32) {
    %c0_i32 = arith.constant 0 : i32
    %c0_i32_0 = arith.constant 0 : i32
    return %arg0, %arg1, %c0_i32 : i32, i32, i32
  }
}

module attributes {stable_mosaic.version = 11 : i64} {
  func.func @_linear_kernel(%arg0: i32, %arg1: i32, %arg2: i32, %arg3: memref<16x32xf32, #tpu.memory_space<vmem>>, %arg4: memref<32x32xf32, #tpu.memory_space<vmem>>, %arg5: memref<1x32xf32, #tpu.memory_space<vmem>>, %arg6: memref<16x32xf32, #tpu.memory_space<vmem>>, %arg7: memref<16x32xf32, #tpu.memory_space<vmem>>) attributes {dimension_semantics = [#tpu.dimension_semantics<parallel>, #tpu.dimension_semantics<parallel>, #tpu.dimension_semantics<arbitrary>], iteration_bounds = array<i64: 1, 1, 1>, scalar_prefetch = 0 : i64, scratch_operands = 1 : i64, tpu.core_type = #tpu.core_type<tc>, window_params = [{transform_indices = @transform_0, window_bounds = array<i64: 16, 32>}, {transform_indices = @transform_1, window_bounds = array<i64: 32, 32>}, {transform_indices = @transform_2, window_bounds = array<i64: 1, 32>}, {transform_indices = @transform_3, window_bounds = array<i64: 16, 32>}]} {
    %c0_i32 = arith.constant 0 : i32
    %0 = arith.cmpi eq, %arg2, %c0_i32 : i32
    %1 = arith.extui %0 : i1 to i32
    %c0_i32_0 = arith.constant 0 : i32
    %2 = arith.cmpi ne, %1, %c0_i32_0 : i32
    scf.if %2 {
      %cst_10 = arith.constant 0.000000e+00 : f32
      %12 = vector.broadcast %cst_10 : f32 to vector<16x32xf32>
      %c0_11 = arith.constant 0 : index
      %c0_12 = arith.constant 0 : index
      %13 = vector.load %arg7[%c0_11, %c0_12] : memref<16x32xf32, #tpu.memory_space<vmem>>, vector<16x32xf32>
      tpu.vector_store %arg7[%c0_11, %c0_12], %12 {strides = array<i32>} : memref<16x32xf32, #tpu.memory_space<vmem>>, vector<16x32xf32>,
    } else {
    }
    %c0 = arith.constant 0 : index
    %c0_1 = arith.constant 0 : index
    %3 = vector.load %arg7[%c0, %c0_1] : memref<16x32xf32, #tpu.memory_space<vmem>>, vector<16x32xf32>
    %c0_2 = arith.constant 0 : index
    %c0_3 = arith.constant 0 : index
    %4 = vector.load %arg3[%c0_2, %c0_3] : memref<16x32xf32, #tpu.memory_space<vmem>>, vector<16x32xf32>
    %c0_4 = arith.constant 0 : index
    %c0_5 = arith.constant 0 : index
    %5 = vector.load %arg4[%c0_4, %c0_5] : memref<32x32xf32, #tpu.memory_space<vmem>>, vector<32x32xf32>
    %cst = arith.constant dense<0.000000e+00> : vector<16x32xf32>
    %6 = tpu.matmul %4, %5, %cst {dimension_numbers = #tpu.dot_dimension_numbers<[1], [0], [0], [1], [0, 0, 1, 1], [], []>} : vector<16x32xf32>, vector<32x32xf32>, vector<16x32xf32> -> vector<16x32xf32>
    %7 = arith.addf %3, %6 : vector<16x32xf32>
    %c0_6 = arith.constant 0 : index
    %c0_7 = arith.constant 0 : index
    %8 = vector.load %arg7[%c0_6, %c0_7] : memref<16x32xf32, #tpu.memory_space<vmem>>, vector<16x32xf32>
    tpu.vector_store %arg7[%c0_6, %c0_7], %7 {strides = array<i32>} : memref<16x32xf32, #tpu.memory_space<vmem>>, vector<16x32xf32>,
    %c0_i32_8 = arith.constant 0 : i32
    %9 = arith.cmpi eq, %arg2, %c0_i32_8 : i32
    %10 = arith.extui %9 : i1 to i32
    %c0_i32_9 = arith.constant 0 : i32
    %11 = arith.cmpi ne, %10, %c0_i32_9 : i32
    scf.if %11 {
      %c0_10 = arith.constant 0 : index
      %c0_11 = arith.constant 0 : index
      %12 = vector.load %arg7[%c0_10, %c0_11] : memref<16x32xf32, #tpu.memory_space<vmem>>, vector<16x32xf32>
      %c0_12 = arith.constant 0 : index
      %c0_13 = arith.constant 0 : index
      %13 = vector.load %arg5[%c0_12, %c0_13] : memref<1x32xf32, #tpu.memory_space<vmem>>, vector<1x32xf32>
      %14 = vector.broadcast %13 : vector<1x32xf32> to vector<16x32xf32>
      %15 = arith.addf %12, %14 : vector<16x32xf32>
      %c0_14 = arith.constant 0 : index
      %c0_15 = arith.constant 0 : index
      %16 = vector.load %arg6[%c0_14, %c0_15] : memref<16x32xf32, #tpu.memory_space<vmem>>, vector<16x32xf32>
      tpu.vector_store %arg6[%c0_14, %c0_15], %15 {strides = array<i32>} : memref<16x32xf32, #tpu.memory_space<vmem>>, vector<16x32xf32>,
    } else {
    }
    return
  }
  func.func @transform_0(%arg0: i32, %arg1: i32, %arg2: i32) -> (i32, i32) {
    %c0_i32 = arith.constant 0 : i32
    return %arg0, %arg2 : i32, i32
  }
  func.func @transform_1(%arg0: i32, %arg1: i32, %arg2: i32) -> (i32, i32) {
    %c0_i32 = arith.constant 0 : i32
    return %arg2, %arg1 : i32, i32
  }
  func.func @transform_2(%arg0: i32, %arg1: i32, %arg2: i32) -> (i32, i32) {
    %c0_i32 = arith.constant 0 : i32
    %c0_i32_0 = arith.constant 0 : i32
    return %c0_i32, %arg1 : i32, i32
  }
  func.func @transform_3(%arg0: i32, %arg1: i32, %arg2: i32) -> (i32, i32) {
    %c0_i32 = arith.constant 0 : i32
    return %arg0, %arg1 : i32, i32
  }
}

</mosaic_0001>

<bundles_post_ra>
// kernel: multi_headed_attention_block.5
= control target key start
LH: loop header
LB: loop body
LE: loop exit
PB: predicated region body
PF: predicated region fallthrough
CT: control target
= control target key end

     0   :  { %vm19_vm0 = vcmask 261120   ;;  %v204_v6 = vmov 0.0   ;;  %s269_s0 = inlined_call_operand.vmem [shape: f32[16,32], index: 0, kind: input, shape index: {}]   ;;  %s270_s1 = inlined_call_operand.vmem [shape: f32[32,32], index: 1, kind: input, shape index: {}]   ;;  %s271_s2 = inlined_call_operand.vmem [shape: f32[1,32], index: 2, kind: input, shape index: {}]   ;;  %s272_s3 = inlined_call_operand.hbm [shape: f32[16,32], index: 3, kind: output, shape index: {}]  }
   0x1   :  { %v26_v0 = vld [vmem:[%s270_s1] sm:$0xff]  ;;  %v27_v1 = vld [vmem:[%s270_s1 + $0x8] sm:$0xff]  ;;  %v28_v2 = vld [vmem:[%s270_s1 + $0x10] sm:$0xff]  ;;  %21 = vst.msk [vmem:[#allocation2 + $0x8] sm:$0xff] %vm19_vm0, %v204_v6 }
   0x2   :  { %v168_v3 = vpack.c.bf16 %v27_v1, %v26_v0  ;;  %v29_v4 = vld [vmem:[%s270_s1 + $0x18] sm:$0xff]  ;;  %v24_v5 = vld [vmem:[%s269_s0] sm:$0xff]  ;;  %20 = vst.msk [vmem:[#allocation2] sm:$0xff] %vm19_vm0, %v204_v6 }
   0x3   :  { %v172_v7 = vpack.c.bf16 %v29_v4, %v28_v2  ;;  %165 = vmatprep.mubr.msk.f32.mxu0 %vm19_vm0, %v24_v5 }
   0x4   :  { %8 = vsyncpa [#allocation4], 0  ;;  %169 = vmatprep.subr.bf16.mxu0 %v168_v3  ;;  %v25_v8 = vld [vmem:[%s269_s0 + $0x8] sm:$0xff]  ;;  %v150_v15 = vld [vmem:[%s271_s2] ss:$0 sm:$0xff]  ;;  %s205_s25 = smov [#allocation3]  }
   0x5   :  { %171 = vmatpush3.bf16.msra.mxu0 %v168_v3  ;;  %s137_s26 = sshll.u32 %s205_s25, 4  ;;  %s138_s26 = int_to_ptr.vmem [resolvable:$true] %s137_s26 }
   0x6   :  { %173 = vmatprep.subr.bf16.mxu0 %v172_v7  ;;  %s180_s0 = scalar_lea.vmem %s138_s26, 256  ;;  %p185_p1 = scmp.lt.s32.totalorder %s138_s26, %s138_s26 }
   0x7   :  { %p181_p0 = scmp.ne.s32.totalorder %s138_s26, %s180_s0  ;;  %p186_p2 = scmp.lt.s32.totalorder %s180_s0, %s180_s0 }
   0x8   :  { %v23_v9 = vld [vmem:[#allocation2 + $0x8] sm:$0xff] }
   0x9   :  { %175 = vmatpush3.bf16.msra.mxu0 %v172_v7  ;;  %v22_v10 = vld [vmem:[#allocation2] sm:$0xff]  ;;  %p187_p3 = por %p186_p2, %p185_p1 }
   0xb   :  { %p188_p4 = pnand %p187_p3, %p181_p0 }
   0xc   :  { %166 = vmatmul.mubr.msk.f32.vlgmr.msra.gmra.mrb[0].mxu0 %vm19_vm0, %v25_v8 }
  0xdf   :  { %v167_v11 = vpop.f32.mrb[0].mxu0 }
  0xe0   :  { %v113_v12 = vadd.f32 %v167_v11, %v23_v9  ;;  %v103_v13 = vpop.f32.mrb[1].mxu0 }
  0xe1   :  { %v112_v14 = vadd.f32 %v103_v13, %v22_v10 }
  0xe2   :  { %115 = vst.msk [vmem:[#allocation2 + $0x8] sm:$0xff] %vm19_vm0, %v113_v12 }
  0xe3   :  { %114 = vst.msk [vmem:[#allocation2] sm:$0xff] %vm19_vm0, %v112_v14 }
  0xe9   :  { %v120_v16 = vld [vmem:[#allocation2 + $0x8] sm:$0xff] }
  0xea   :  { %v119_v17 = vld [vmem:[#allocation2] sm:$0xff]  ;;  %v129_v18 = vadd.f32 %v150_v15, %v120_v16 }
  0xeb   :  { %v128_v19 = vadd.f32 %v150_v15, %v119_v17 }
  0xec   :  { %131 = vst.msk [vmem:[#allocation3 + $0x8] sm:$0xff] %vm19_vm0, %v129_v18 }
  0xed   :  { %130 = vst.msk [vmem:[#allocation3] sm:$0xff] %vm19_vm0, %v128_v19 }
  0xee   :  { %191 = shalt.err (!%p188_p4)
}
  0xef   :  { %s192_s28 = scalar_lea.hbm %s272_s3, 256 }
  0xf0   :  { %p193_p5 = scmp.ne.s32.totalorder %s272_s3, %s192_s28  ;;  %p196_p6 = scmp.lt.u32.totalorder %s192_s28, %s272_s3 }
  0xf2   :  { %p198_p7 = pnand %p196_p6, %p193_p5 }
  0xf4   :  { %201 = shalt.err (!%p198_p7)
}
  0xf5   :  { %s206_s6 = smov 128   ;;  %s207_s7 = smov 8  }
  0xf6   :  { %143 = dma.vmem_to_hbm [thread:$0]  %s138_s26, 256, %s272_s3, [#allocation4], %s206_s6, %s206_s6, %s207_s7  }
  0xf7   :  { %202 = dma.done.wait [#allocation4], 256  }
  0xf8   :  { %203 = vsyncadd [#allocation4], 4294967040 }
  0xf9   :  { %147 = vsyncpa [#allocation4], 1 }

// kernel: multi_headed_attention_block.3
= control target key start
LH: loop header
LB: loop body
LE: loop exit
PB: predicated region body
PF: predicated region fallthrough
CT: control target
= control target key end

     0   :  { %vm33_vm0 = vcmask 261120   ;;  %v443_v3 = vmov 0.0   ;;  %s587_s1 = inlined_call_operand.vmem [shape: f32[32,32], index: 1, kind: input, shape index: {}]   ;;  %s588_s0 = inlined_call_operand.vmem [shape: f32[16,32], index: 0, kind: input, shape index: {}]   ;;  %s589_s2 = inlined_call_operand.vmem [shape: f32[32,32], index: 2, kind: input, shape index: {}]   ;;  %s590_s3 = inlined_call_operand.vmem [shape: f32[32,32], index: 3, kind: input, shape index: {}]   ;;  %s591_s4 = inlined_call_operand.vmem [shape: f32[1,32], index: 4, kind: input, shape index: {}]   ;;  %s592_s5 = inlined_call_operand.vmem [shape: f32[1,32], index: 5, kind: input, shape index: {}]   ;;  %s593_s7 = inlined_call_operand.vmem [shape: f32[16,32], index: 7, kind: output, shape index: {0}]   ;;  %s594_s8 = inlined_call_operand.vmem [shape: f32[16,32], index: 8, kind: output, shape index: {1}]   ;;  %s595_s6 = inlined_call_operand.vmem [shape: f32[1,32], index: 6, kind: input, shape index: {}]   ;;  %s596_s9 = inlined_call_operand.vmem [shape: f32[16,32], index: 9, kind: output, shape index: {2}]  }
   0x1   :  { %v44_v0 = vld [vmem:[%s587_s1] sm:$0xff]  ;;  %v45_v1 = vld [vmem:[%s587_s1 + $0x8] sm:$0xff]  ;;  %v46_v2 = vld [vmem:[%s587_s1 + $0x10] sm:$0xff]  ;;  %35 = vst.msk [vmem:[#allocation2 + $0x8] sm:$0xff] %vm33_vm0, %v443_v3 }
   0x2   :  { %34 = vst.msk [vmem:[#allocation2] sm:$0xff] %vm33_vm0, %v443_v3  ;;  %36 = vst.msk [vmem:[#allocation3] sm:$0xff] %vm33_vm0, %v443_v3  ;;  %v418_v4 = vpack.c.bf16 %v45_v1, %v44_v0  ;;  %v47_v5 = vld [vmem:[%s587_s1 + $0x18] sm:$0xff]  ;;  %v40_v6 = vld [vmem:[%s588_s0] sm:$0xff] }
   0x3   :  { %37 = vst.msk [vmem:[#allocation3 + $0x8] sm:$0xff] %vm33_vm0, %v443_v3  ;;  %38 = vst.msk [vmem:[#allocation4] sm:$0xff] %vm33_vm0, %v443_v3  ;;  %v136_v7 = vld [vmem:[%s589_s2] sm:$0xff]  ;;  %v422_v8 = vpack.c.bf16 %v47_v5, %v46_v2  ;;  %393 = vmatprep.mubr.msk.f32.mxu0 %vm33_vm0, %v40_v6  ;;  %v137_v9 = vld [vmem:[%s589_s2 + $0x8] sm:$0xff]  ;;  %404 = vmatprep.mubr.msk.f32.mxu1 %vm33_vm0, %v40_v6 }
   0x4   :  { %39 = vst.msk [vmem:[#allocation4 + $0x8] sm:$0xff] %vm33_vm0, %v443_v3  ;;  %v221_v10 = vld [vmem:[%s590_s3] sm:$0xff]  ;;  %419 = vmatprep.subr.bf16.mxu0 %v418_v4  ;;  %v426_v11 = vpack.c.bf16 %v137_v9, %v136_v7  ;;  %v222_v12 = vld [vmem:[%s590_s3 + $0x8] sm:$0xff]  ;;  %v138_v13 = vld [vmem:[%s589_s2 + $0x10] sm:$0xff] }
   0x5   :  { %v139_v14 = vld [vmem:[%s589_s2 + $0x18] sm:$0xff]  ;;  %421 = vmatpush3.bf16.msra.mxu0 %v418_v4  ;;  %v434_v16 = vpack.c.bf16 %v222_v12, %v221_v10  ;;  %v223_v17 = vld [vmem:[%s590_s3 + $0x10] sm:$0xff]  ;;  %v41_v19 = vld [vmem:[%s588_s0 + $0x8] sm:$0xff] }
   0x6   :  { %v430_v15 = vpack.c.bf16 %v139_v14, %v138_v13  ;;  %423 = vmatprep.subr.bf16.mxu0 %v422_v8  ;;  %427 = vmatprep.subr.bf16.mxu1 %v426_v11  ;;  %v224_v18 = vld [vmem:[%s590_s3 + $0x18] sm:$0xff]  ;;  %v364_v35 = vld [vmem:[%s591_s4] ss:$0 sm:$0xff] }
   0x7   :  { %429 = vmatpush3.bf16.msra.mxu1 %v426_v11  ;;  %v438_v20 = vpack.c.bf16 %v224_v18, %v223_v17  ;;  %v365_v40 = vld [vmem:[%s592_s5] ss:$0 sm:$0xff] }
   0x8   :  { %431 = vmatprep.subr.bf16.mxu1 %v430_v15  ;;  %v43_v21 = vld [vmem:[#allocation2 + $0x8] sm:$0xff]  ;;  %v366_v49 = vld [vmem:[%s595_s6] ss:$0 sm:$0xff] }
   0x9   :  { %425 = vmatpush3.bf16.msra.mxu0 %v422_v8  ;;  %v42_v22 = vld [vmem:[#allocation2] sm:$0xff]  ;;  %v134_v27 = vld [vmem:[#allocation3] sm:$0xff] }
   0xa   :  { %435 = vmatprep.subr.bf16.mxu0 %v434_v16  ;;  %v135_v24 = vld [vmem:[#allocation3 + $0x8] sm:$0xff]  ;;  %v219_v34 = vld [vmem:[#allocation4] sm:$0xff] }
   0xb   :  { %433 = vmatpush3.bf16.msra.mxu1 %v430_v15  ;;  %v220_v33 = vld [vmem:[#allocation4 + $0x8] sm:$0xff] }
   0xc   :  { %394 = vmatmul.mubr.msk.f32.vlgmr.msra.gmra.mrb[0].mxu0 %vm33_vm0, %v41_v19 }
   0xd   :  { %437 = vmatpush3.bf16.msra.mxu0 %v434_v16  ;;  %415 = vmatprep.mubr.msk.f32.mxu0 %vm33_vm0, %v40_v6 }
   0xe   :  { %439 = vmatprep.subr.bf16.mxu0 %v438_v20  ;;  %405 = vmatmul.mubr.msk.f32.vlgmr.msra.gmra.mrb[0].mxu1 %vm33_vm0, %v41_v19 }
  0x11   :  { %441 = vmatpush3.bf16.msra.mxu0 %v438_v20 }
  0x14   :  { %416 = vmatmul.mubr.msk.f32.vlgmr.msra.gmra.mrb[2].mxu0 %vm33_vm0, %v41_v19 }
  0xdf   :  { %v395_v23 = vpop.f32.mrb[0].mxu0 }
  0xe0   :  { %v131_v25 = vadd.f32 %v395_v23, %v43_v21  ;;  %v121_v26 = vpop.f32.mrb[1].mxu0 }
  0xe1   :  { %v130_v28 = vadd.f32 %v121_v26, %v42_v22  ;;  %v406_v29 = vpop.f32.mrb[0].mxu1 }
  0xe2   :  { %133 = vst.msk [vmem:[#allocation2 + $0x8] sm:$0xff] %vm33_vm0, %v131_v25  ;;  %v216_v30 = vadd.f32 %v406_v29, %v135_v24  ;;  %v206_v31 = vpop.f32.mrb[1].mxu1 }
  0xe3   :  { %132 = vst.msk [vmem:[#allocation2] sm:$0xff] %vm33_vm0, %v130_v28  ;;  %v215_v32 = vadd.f32 %v206_v31, %v134_v27 }
  0xe4   :  { %218 = vst.msk [vmem:[#allocation3 + $0x8] sm:$0xff] %vm33_vm0, %v216_v30 }
  0xe5   :  { %217 = vst.msk [vmem:[#allocation3] sm:$0xff] %vm33_vm0, %v215_v32 }
  0xe7   :  { %v417_v36 = vpop.f32.mrb[2].mxu0 }
  0xe8   :  { %v301_v37 = vadd.f32 %v417_v36, %v220_v33  ;;  %v291_v38 = vpop.f32.mrb[3].mxu0 }
  0xe9   :  { %v308_v39 = vld [vmem:[#allocation2 + $0x8] sm:$0xff]  ;;  %v300_v41 = vadd.f32 %v291_v38, %v219_v34 }
  0xea   :  { %v317_v42 = vadd.f32 %v364_v35, %v308_v39  ;;  %v307_v43 = vld [vmem:[#allocation2] sm:$0xff]  ;;  %303 = vst.msk [vmem:[#allocation4 + $0x8] sm:$0xff] %vm33_vm0, %v301_v37 }
  0xeb   :  { %v316_v44 = vadd.f32 %v364_v35, %v307_v43  ;;  %v321_v45 = vld [vmem:[#allocation3 + $0x8] sm:$0xff]  ;;  %302 = vst.msk [vmem:[#allocation4] sm:$0xff] %vm33_vm0, %v300_v41 }
  0xec   :  { %319 = vst.msk [vmem:[%s593_s7 + $0x8] sm:$0xff] %vm33_vm0, %v317_v42  ;;  %v330_v46 = vadd.f32 %v365_v40, %v321_v45  ;;  %v320_v47 = vld [vmem:[#allocation3] sm:$0xff] }
  0xed   :  { %318 = vst.msk [vmem:[%s593_s7] sm:$0xff] %vm33_vm0, %v316_v44  ;;  %v329_v48 = vadd.f32 %v365_v40, %v320_v47 }
  0xee   :  { %332 = vst.msk [vmem:[%s594_s8 + $0x8] sm:$0xff] %vm33_vm0, %v330_v46 }
  0xef   :  { %331 = vst.msk [vmem:[%s594_s8] sm:$0xff] %vm33_vm0, %v329_v48 }
  0xf1   :  { %v334_v50 = vld [vmem:[#allocation4 + $0x8] sm:$0xff] }
  0xf2   :  { %v343_v51 = vadd.f32 %v366_v49, %v334_v50  ;;  %v333_v52 = vld [vmem:[#allocation4] sm:$0xff] }
  0xf3   :  { %v342_v53 = vadd.f32 %v366_v49, %v333_v52 }
  0xf4   :  { %345 = vst.msk [vmem:[%s596_s9 + $0x8] sm:$0xff] %vm33_vm0, %v343_v51 }
  0xf5   :  { %344 = vst.msk [vmem:[%s596_s9] sm:$0xff] %vm33_vm0, %v342_v53 }

// kernel: multi_headed_attention_block.4
= control target key start
LH: loop header
LB: loop body
LE: loop exit
PB: predicated region body
PF: predicated region fallthrough
CT: control target
= control target key end

     0   :  { %s2248_s12 = smov 0   ;;  %s2250_s13 = smov 0   ;;  %s2412_s0 = inlined_call_operand.vmem [shape: f32[2,8,32], index: 0, kind: input, shape index: {}]   ;;  %s2413_s1 = inlined_call_operand.vmem [shape: f32[2,8,32], index: 1, kind: input, shape index: {}]   ;;  %s2414_s2 = inlined_call_operand.vmem [shape: f32[2,8,32], index: 2, kind: input, shape index: {}]   ;;  %s2415_s3 = inlined_call_operand.vmem [shape: f32[2,8,32], index: 3, kind: output, shape index: {}]  }
   0x1   :  { %s2252_s14 = smov 0  }
   0x2 LB: > { %s32_s15 = sadd.s32 1, %s2212_s13  ;;  %p2047_p0 = scmp.ge.s32.totalorder %s2216_s14, 1  ;;  %s2216_s14 = sphi %s2252_s14, %s13_s14   ;;  %s2212_s13 = sphi %s2250_s13, %s2417_s13   ;;  %s2208_s12 = sphi %s2248_s12, %s2416_s12  }
   0x3   : > { %p34_p1 = scmp.ge.s32.totalorder %s32_s15, 2  ;;  %p206_p2 = scmp.lt.s32.totalorder %s2216_s14, 3 }
   0x5   : > { %s2419_s15 = smov (%p34_p1, %s32_s15), 0  ;;  %p207_p3 = pnand %p2047_p0, %p206_p2 }
   0x6   : > { %p252_p4 = scmp.lt.s32.totalorder (!%p207_p3), %s2208_s12, 1  ;;  %vm301_vm0 = vcmask (!%p207_p3), 64512   ;;  %v2218_v0 = vmov (!%p207_p3), 0.0   ;;  %vm2219_vm1 = vmmov (!%p207_p3), 0   ;;  %vm292_vm2 = vcmask (!%p207_p3), 7168   ;;  %s2222_s23 = smov (!%p207_p3), 120  }
   0x7   : > { %210 = sbr.rel (%p207_p3) target bundleno = 1446 (0x5a6), region = 32  ;;  %2094 = vmatprep.subr.mxu0 (!%p207_p3), %v2218_v0  ;;  %302 = vst.msk [vmem:[#allocation4] sm:$0xff] (!%p207_p3), %vm301_vm0, %v2218_v0  ;;  %303 = vst.msk [vmem:[#allocation4 + $0x8] sm:$0xff] (!%p207_p3), %vm301_vm0, %v2218_v0  ;;  %2096 = vmatprep.mubr.msk.f32.mxu0 (!%p207_p3), %vm2219_vm1, %v2218_v0  ;;  %v2220_v4 = vmov (!%p207_p3), -inf   ;;  %v1093_v5 = vlaneseq (!%p207_p3)  ;;  %v2221_v12 = vmov (!%p207_p3), 0   ;;  %s2223_s24 = smov (!%p207_p3), 112  }
   0x8   : > { %304 = vst.msk [vmem:[#allocation4 + $0x10] sm:$0xff] (!%p207_p3), %vm301_vm0, %v2218_v0  ;;  %305 = vst.msk [vmem:[#allocation4 + $0x18] sm:$0xff] (!%p207_p3), %vm301_vm0, %v2218_v0  ;;  %2099 = vmatprep.subr.mxu1 (!%p207_p3), %v2218_v0  ;;  %2101 = vmatprep.mubr.msk.f32.mxu1 (!%p207_p3), %vm2219_vm1, %v2218_v0  ;;  %s2224_s25 = smov (!%p207_p3), 104   ;;  %s2225_s29 = smov (!%p207_p3), 8   ;;  %vm1930_vm4 = vcmask (!%p207_p3), 130048   ;;  %vm1932_vm5 = vcmask (!%p207_p3), 195584  }
   0x9   : > { %293 = vst.msk [vmem:[#allocation2] sm:$0xff] (!%p207_p3), %vm292_vm2, %v2220_v4  ;;  %294 = vst.msk [vmem:[#allocation2 + $0x8] sm:$0xff] (!%p207_p3), %vm292_vm2, %v2220_v4  ;;  %v2307_v6 = vshrl.u32 (!%p207_p3), %v1093_v5, 7  ;;  %v2309_v7 = vand.u32 (!%p207_p3), 127, %v1093_v5  ;;  %2168 = vset.pattern.permute.xlu0 (!%p207_p3), %v2221_v12  ;;  %2169 = vset.pattern.permute.xlu1 (!%p207_p3), %v2221_v12  ;;  %s2226_s30 = smov (!%p207_p3), 16   ;;  %s2227_s4 = smov (!%p207_p3), 24  }
   0xa   : > { %295 = vst.msk [vmem:[#allocation2 + $0x10] sm:$0xff] (!%p207_p3), %vm292_vm2, %v2220_v4  ;;  %296 = vst.msk [vmem:[#allocation2 + $0x18] sm:$0xff] (!%p207_p3), %vm292_vm2, %v2220_v4  ;;  %vm1934_vm6 = vcmask (!%p207_p3), 261120  }
   0xb   : > { %297 = vst.msk [vmem:[#allocation3] sm:$0xff] (!%p207_p3), %vm292_vm2, %v2218_v0  ;;  %298 = vst.msk [vmem:[#allocation3 + $0x8] sm:$0xff] (!%p207_p3), %vm292_vm2, %v2218_v0  ;;  %vm1097_vm3 = vcmp.gt.s32.totalorder (!%p207_p3), %v2309_v7, %v2307_v6 }
   0xc   : > { %299 = vst.msk [vmem:[#allocation3 + $0x10] sm:$0xff] (!%p207_p3), %vm292_vm2, %v2218_v0  ;;  %300 = vst.msk [vmem:[#allocation3 + $0x18] sm:$0xff] (!%p207_p3), %vm292_vm2, %v2218_v0 }
   0xe   : > { %s2421_s12 = smov (!%p252_p4, %s2208_s12), 1 }
   0xf   : > { %s2280_s16 = sshll.u32 %s2421_s12, 3 }
  0x10   : > { %s267_s19 = scalar_lea.vmem %s2413_s1, %s2280_s16  ;;  %s258_s22 = scalar_lea.vmem %s2412_s0, %s2280_s16  ;;  %v2323_v13 = vld [vmem:[#allocation2] sm:$0xff]  ;;  %v1373_v42 = vld [vmem:[#allocation2 + $0x8] sm:$0xff] }
  0x11   : > { %v1100_v1 = vld [vmem:[%s267_s19] sm:$0xff]  ;;  %s278_s28 = scalar_lea.vmem %s2414_s2, %s2280_s16  ;;  %v1571_v45 = vld [vmem:[#allocation2 + $0x10] sm:$0xff]  ;;  %v1769_v49 = vld [vmem:[#allocation2 + $0x18] sm:$0xff]  ;;  %s287_s7 = scalar_lea.vmem %s2415_s3, %s2280_s16 }
  0x12   : > { %v1098_v2 = vld [vmem:[%s258_s22] sm:$0xff]  ;;  %2095 = vmatpush3.xpose.msk.msra.mxu0 %vm301_vm0, %v1100_v1  ;;  %1295 = vrot.lane.b32.xlu1 %v1100_v1, %s2222_s23 }
  0x13   : > { %v1099_v3 = vmul.f32 0.35355338, %v1098_v2  ;;  %2109 = vmatprep.subr.mxu0 %v2218_v0  ;;  %v1101_v17 = vld [vmem:[%s278_s28] sm:$0xff] }
  0x14   : > { %2100 = vmatpush3.msra.mxu1 %v1101_v17 }
  0x15   : > { %2097 = vmatmul.mubr.msk.f32.vlgmr.msra.gmra.mrb[0].mxu0 %vm301_vm0, %v1099_v3  ;;  %2104 = vmatprep.subr.mxu1 %v2218_v0 }
  0x16   : > { %2111 = vmatprep.mubr.msk.f32.mxu0 %vm2219_vm1, %v2218_v0  ;;  %1292 = vrot.lane.b32.xlu1 %v1099_v3, %s2222_s23 }
  0x1a   : > { %1493 = vrot.lane.b32.xlu1 %v1100_v1, %s2223_s24 }
  0x1e   : > { %1490 = vrot.lane.b32.xlu1 %v1099_v3, %s2223_s24 }
  0x22   : > { %1691 = vrot.lane.b32.xlu1 %v1100_v1, %s2224_s25 }
  0x26   : > { %1688 = vrot.lane.b32.xlu1 %v1099_v3, %s2224_s25 }
  0x84   : > { %v1296_v18 = vpop.permute.xlu1 %1295 }
  0x88   : > { %v1293_v21 = vpop.permute.xlu1 %1292 }
  0x8c   : > { %v1494_v23 = vpop.permute.xlu1 %1493 }
  0x90   : > { %v1491_v24 = vpop.permute.xlu1 %1490 }
  0x94   : > { %v1692_v26 = vpop.permute.xlu1 %1691 }
  0x98   : > { %v1689_v27 = vpop.permute.xlu1 %1688 }
  0xe8   : > { %v1175_v8 = vpop.f32.mrb[0].mxu0 }
  0xe9   : > { %v1179_v9 = vsel %vm1097_vm3, -inf, %v1175_v8  ;;  %v2098_v10 = vpop.f32.mrb[1].mxu0 }
  0xea   : > { %v1181_v11 = vsel %vm301_vm0, %v1179_v9, -inf }
  0xeb   : > { %1182 = vmax.xlane.f32.xlu0 %v1181_v11 }
 0x178   : > { %v1183_v14 = vpop.xlane.xlu0 %1182 }
 0x179   : > { %v2326_v15 = vmax.f32 %v2323_v13, %v1183_v14 }
 0x17b   : > { %v1185_v16 = vsub.f32 %v2323_v13, %v2326_v15  ;;  %1286 = vst.msk [vmem:[#allocation2] sm:$0xff] %vm292_vm2, %v2326_v15  ;;  %1190 = vperm.xlu0 %2168, %v2326_v15   ;;  %v1390_v15 = vld [vmem:[#allocation3 + $0x8] sm:$0xff] }
 0x17d   : > { %v1186_v12 = vmul.f32 1.442695, %v1185_v16 }
 0x1fa   : > { %v1191_v19 = vpop.permute.xlu0 %1190 }
 0x1fb   : > { %v1193_v20 = vsub.f32 %v1179_v9, %v1191_v19 }
 0x1fd   : > { %v1194_v22 = vmul.f32 1.442695, %v1193_v20  ;;  %v1196_v20 = vld [vmem:[#allocation3] sm:$0xff] }
 0x1ff   : > { %2170 = vpow2.f32 %v1194_v22 }
 0x209   : > { %v2171_v25 = vpop.eup %2170 }
 0x20a   : > { %2102 = vmatmul.mubr.msk.f32.vlgmr.msra.gmra.mrb[0].mxu1 %vm301_vm0, %v2171_v25  ;;  %v1198_v54 = vsel %vm301_vm0, %v2171_v25, 0.0 }
 0x20b   : > { %2105 = vmatpush3.xpose.msk.msra.mxu1 %vm301_vm0, %v1296_v18  ;;  %2106 = vmatprep.mubr.msk.f32.mxu1 %vm2219_vm1, %v2218_v0 }
 0x20c   : > { %2114 = vmatprep.subr.mxu1 %v2218_v0 }
 0x20e   : > { %2107 = vmatmul.mubr.msk.f32.vlgmr.msra.gmra.mrb[2].mxu1 %vm301_vm0, %v1293_v21 }
 0x20f   : > { %2115 = vmatpush3.xpose.msk.msra.mxu1 %vm301_vm0, %v1494_v23  ;;  %2116 = vmatprep.mubr.msk.f32.mxu1 %vm2219_vm1, %v2218_v0 }
 0x210   : > { %2124 = vmatprep.subr.mxu1 %v2218_v0 }
 0x212   : > { %2117 = vmatmul.mubr.msk.f32.vlgmr.msra.gmra.mrb[4].mxu1 %vm301_vm0, %v1491_v24 }
 0x213   : > { %2125 = vmatpush3.xpose.msk.msra.mxu1 %vm301_vm0, %v1692_v26  ;;  %2126 = vmatprep.mubr.msk.f32.mxu1 %vm2219_vm1, %v2218_v0  ;;  %v1588_v26 = vld [vmem:[#allocation3 + $0x10] sm:$0xff] }
 0x216   : > { %2127 = vmatmul.mubr.msk.f32.vlgmr.msra.gmra.mrb[6].mxu1 %vm301_vm0, %v1689_v27 }
 0x2dd   : > { %v2353_v28 = vpop.f32.mrb[0].mxu1 }
 0x2de   : > { %v2103_v29 = vpop.f32.mrb[1].mxu1 }
 0x2e1   : > { %v1367_v30 = vpop.f32.mrb[2].mxu1 }
 0x2e2   : > { %v1371_v31 = vsel %vm1097_vm3, -inf, %v1367_v30  ;;  %v2108_v32 = vpop.f32.mrb[3].mxu1 }
 0x2e3   : > { %v1374_v33 = vsel %vm301_vm0, %v1371_v31, -inf }
 0x2e4   : > { %1375 = vmax.xlane.f32.xlu1 %v1374_v33 }
 0x2e5   : > { %v1565_v34 = vpop.f32.mrb[4].mxu1 }
 0x2e6   : > { %v1569_v35 = vsel %vm1097_vm3, -inf, %v1565_v34  ;;  %v2118_v36 = vpop.f32.mrb[5].mxu1 }
 0x2e7   : > { %v1572_v37 = vsel %vm301_vm0, %v1569_v35, -inf }
 0x2e8   : > { %1573 = vmax.xlane.f32.xlu0 %v1572_v37  ;;  %v1204_v37 = vld [vmem:[#allocation4] sm:$0xff] }
 0x2e9   : > { %v1763_v38 = vpop.f32.mrb[6].mxu1 }
 0x2ea   : > { %v1767_v39 = vsel %vm1097_vm3, -inf, %v1763_v38  ;;  %v2128_v40 = vpop.f32.mrb[7].mxu1 }
 0x2eb   : > { %v1770_v41 = vsel %vm301_vm0, %v1767_v39, -inf }
 0x2ec   : > { %1771 = vmax.xlane.f32.xlu1 %v1770_v41 }
 0x371   : > { %v1376_v43 = vpop.xlane.xlu1 %1375 }
 0x372   : > { %v1377_v44 = vmax.f32 %v1373_v42, %v1376_v43 }
 0x374   : > { %v1378_v46 = vsub.f32 %v1373_v42, %v1377_v44  ;;  %1484 = vst.msk [vmem:[#allocation2 + $0x8] sm:$0xff] %vm292_vm2, %v1377_v44  ;;  %1383 = vperm.xlu1 %2169, %v1377_v44  }
 0x375   : > { %v1574_v47 = vpop.xlane.xlu0 %1573 }
 0x376   : > { %v1575_v48 = vmax.f32 %v1571_v45, %v1574_v47  ;;  %v1379_v9 = vmul.f32 1.442695, %v1378_v46  ;;  %v1398_v46 = vld [vmem:[#allocation4 + $0x8] sm:$0xff] }
 0x378   : > { %v1576_v50 = vsub.f32 %v1571_v45, %v1575_v48  ;;  %1682 = vst.msk [vmem:[#allocation2 + $0x10] sm:$0xff] %vm292_vm2, %v1575_v48  ;;  %1581 = vperm.xlu0 %2168, %v1575_v48  }
 0x379   : > { %v1772_v51 = vpop.xlane.xlu1 %1771 }
 0x37a   : > { %v1773_v52 = vmax.f32 %v1769_v49, %v1772_v51  ;;  %v1577_v14 = vmul.f32 1.442695, %v1576_v50 }
 0x37c   : > { %v1774_v53 = vsub.f32 %v1769_v49, %v1773_v52  ;;  %1880 = vst.msk [vmem:[#allocation2 + $0x18] sm:$0xff] %vm292_vm2, %v1773_v52  ;;  %1779 = vperm.xlu1 %2169, %v1773_v52   ;;  %v1596_v49 = vld [vmem:[#allocation4 + $0x10] sm:$0xff] }
 0x37e   : > { %v1775_v11 = vmul.f32 1.442695, %v1774_v53 }
 0x380   : > { %1406 = vrot.lane.b32.xlu1 %v1101_v17, %s2222_s23 }
 0x384   : > { %1604 = vrot.lane.b32.xlu1 %v1101_v17, %s2223_s24 }
 0x388   : > { %1802 = vrot.lane.b32.xlu1 %v1101_v17, %s2224_s25 }
 0x3ac   : > { %1199 = vadd.xlane.f32.xlu1 %v1198_v54 }
 0x3f3   : > { %v1384_v55 = vpop.permute.xlu1 %1383 }
 0x3f4   : > { %v1386_v56 = vsub.f32 %v1371_v31, %v1384_v55  ;;  %v1786_v31 = vld [vmem:[#allocation3 + $0x18] sm:$0xff] }
 0x3f6   : > { %v1387_v57 = vmul.f32 1.442695, %v1386_v56 }
 0x3f7   : > { %v1582_v58 = vpop.permute.xlu0 %1581 }
 0x3f8   : > { %2172 = vpow2.f32 %v1387_v57  ;;  %v1584_v59 = vsub.f32 %v1569_v35, %v1582_v58 }
 0x3fa   : > { %v1585_v60 = vmul.f32 1.442695, %v1584_v59 }
 0x3fb   : > { %v1780_v61 = vpop.permute.xlu1 %1779 }
 0x3fc   : > { %2174 = vpow2.f32 %v1585_v60  ;;  %v1782_v62 = vsub.f32 %v1767_v39, %v1780_v61 }
 0x3fe   : > { %v1783_v63 = vmul.f32 1.442695, %v1782_v62 }
 0x3ff   : > { %v1407_v1 = vpop.permute.xlu1 %1406 }
 0x400   : > { %2176 = vpow2.f32 %v1783_v63  ;;  %2110 = vmatpush3.msra.mxu0 %v1407_v1 }
 0x401   : > { %2119 = vmatprep.subr.mxu0 %v2218_v0  ;;  %2178 = vpow2.f32 %v1379_v9 }
 0x402   : > { %v2173_v2 = vpop.eup %2172  ;;  %2180 = vpow2.f32 %v1775_v11 }
 0x403   : > { %2112 = vmatmul.mubr.msk.f32.vlgmr.msra.gmra.mrb[2].mxu0 %vm301_vm0, %v2173_v2  ;;  %v1392_v3 = vsel %vm301_vm0, %v2173_v2, 0.0  ;;  %v1605_v4 = vpop.permute.xlu1 %1604  ;;  %2182 = vpow2.f32 %v1186_v12 }
 0x404   : > { %1393 = vadd.xlane.f32.xlu0 %v1392_v3  ;;  %2120 = vmatpush3.msra.mxu0 %v1605_v4  ;;  %2184 = vpow2.f32 %v1577_v14 }
 0x405   : > { %2121 = vmatprep.mubr.msk.f32.mxu0 %vm2219_vm1, %v2218_v0  ;;  %2129 = vmatprep.subr.mxu0 %v2218_v0 }
 0x406   : > { %v2175_v5 = vpop.eup %2174 }
 0x407   : > { %2122 = vmatmul.mubr.msk.f32.vlgmr.msra.gmra.mrb[4].mxu0 %vm301_vm0, %v2175_v5  ;;  %v1590_v6 = vsel %vm301_vm0, %v2175_v5, 0.0  ;;  %v1803_v7 = vpop.permute.xlu1 %1802 }
 0x408   : > { %1591 = vadd.xlane.f32.xlu1 %v1590_v6  ;;  %2130 = vmatpush3.msra.mxu0 %v1803_v7 }
 0x409   : > { %2131 = vmatprep.mubr.msk.f32.mxu0 %vm2219_vm1, %v2218_v0 }
 0x40a   : > { %v2177_v8 = vpop.eup %2176 }
 0x40b   : > { %2132 = vmatmul.mubr.msk.f32.vlgmr.msra.gmra.mrb[6].mxu0 %vm301_vm0, %v2177_v8  ;;  %v1788_v10 = vsel %vm301_vm0, %v2177_v8, 0.0  ;;  %v2179_v17 = vpop.eup %2178 }
 0x40c   : > { %1789 = vadd.xlane.f32.xlu0 %v1788_v10  ;;  %v2181_v0 = vpop.eup %2180  ;;  %v1391_v16 = vmul.f32 %v2179_v17, %v1390_v15 }
 0x40d   : > { %v2183_v18 = vpop.eup %2182  ;;  %v1787_v33 = vmul.f32 %v2181_v0, %v1786_v31 }
 0x40e   : > { %v2185_v19 = vpop.eup %2184  ;;  %v1197_v21 = vmul.f32 %v2183_v18, %v1196_v20 }
 0x40f   : > { %v1589_v29 = vmul.f32 %v2185_v19, %v1588_v26 }
 0x419   : > { %1401 = vperm.xlu1 %2169, %v2179_v17  }
 0x41d   : > { %1797 = vperm.xlu1 %2169, %v2181_v0  }
 0x422   : > { %1207 = vperm.xlu0 %2168, %v2183_v18  }
 0x426   : > { %1599 = vperm.xlu0 %2168, %v2185_v19  }
 0x439   : > { %v1200_v22 = vpop.xlane.xlu1 %1199 }
 0x43a   : > { %v1201_v23 = vadd.f32 %v1200_v22, %v1197_v21 }
 0x43c   : > { %1203 = vst.msk [vmem:[#allocation3] sm:$0xff] %vm292_vm2, %v1201_v23 }
 0x443   : > { %v1881_v24 = vld [vmem:[#allocation3] sm:$0xff] }
 0x444   : > { %2186 = vrcp.f32 %v1881_v24 }
 0x44e   : > { %v2187_v13 = vpop.eup %2186 }
 0x44f   : > { %1886 = vperm.xlu1 %2169, %v2187_v13  }
 0x491   : > { %v1394_v25 = vpop.xlane.xlu0 %1393 }
 0x492   : > { %v1395_v27 = vadd.f32 %v1394_v25, %v1391_v16 }
 0x494   : > { %1396 = vst.msk [vmem:[#allocation3 + $0x8] sm:$0xff] %vm292_vm2, %v1395_v27 }
 0x495   : > { %v1592_v30 = vpop.xlane.xlu1 %1591 }
 0x496   : > { %v1593_v32 = vadd.f32 %v1592_v30, %v1589_v29 }
 0x498   : > { %1594 = vst.msk [vmem:[#allocation3 + $0x10] sm:$0xff] %vm292_vm2, %v1593_v32 }
 0x499   : > { %v1790_v34 = vpop.xlane.xlu0 %1789  ;;  %v1402_v47 = vpop.permute.xlu1 %1401 }
 0x49a   : > { %v1791_v35 = vadd.f32 %v1790_v34, %v1787_v33  ;;  %v1404_v48 = vmul.f32 %v1402_v47, %v1398_v46 }
 0x49b   : > { %v1890_v36 = vld [vmem:[#allocation3 + $0x8] sm:$0xff] }
 0x49c   : > { %1792 = vst.msk [vmem:[#allocation3 + $0x18] sm:$0xff] %vm292_vm2, %v1791_v35  ;;  %2188 = vrcp.f32 %v1890_v36 }
 0x49d   : > { %v1798_v55 = vpop.permute.xlu1 %1797 }
 0x49f   : > { %v1899_v38 = vld [vmem:[#allocation3 + $0x10] sm:$0xff] }
 0x4a0   : > { %2190 = vrcp.f32 %v1899_v38 }
 0x4a1   : > { %v1208_v39 = vpop.permute.xlu0 %1207 }
 0x4a2   : > { %v1210_v40 = vmul.f32 %v1208_v39, %v1204_v37 }
 0x4a3   : > { %v1908_v41 = vld [vmem:[#allocation3 + $0x18] sm:$0xff] }
 0x4a4   : > { %v1284_v42 = vadd.f32 %v2353_v28, %v1210_v40  ;;  %2192 = vrcp.f32 %v1908_v41  ;;  %v1794_v28 = vld [vmem:[#allocation4 + $0x18] sm:$0xff] }
 0x4a5   : > { %v1600_v50 = vpop.permute.xlu0 %1599  ;;  %v1800_v59 = vmul.f32 %v1798_v55, %v1794_v28 }
 0x4a6   : > { %v2189_v43 = vpop.eup %2188  ;;  %1285 = vst.msk [vmem:[#allocation4] sm:$0xff] %vm301_vm0, %v1284_v42  ;;  %v1602_v54 = vmul.f32 %v1600_v50, %v1596_v49 }
 0x4a7   : > { %1895 = vperm.xlu0 %2168, %v2189_v43  }
 0x4aa   : > { %v2191_v44 = vpop.eup %2190 }
 0x4ab   : > { %1904 = vperm.xlu1 %2169, %v2191_v44  }
 0x4ad   : > { %v1883_v10 = vld [vmem:[#allocation4] sm:$0xff] }
 0x4ae   : > { %v2193_v45 = vpop.eup %2192 }
 0x4af   : > { %1913 = vperm.xlu0 %2168, %v2193_v45  }
 0x4ce   : > { %v1887_v63 = vpop.permute.xlu1 %1886 }
 0x4cf   : > { %v1889_v12 = vmul.f32 %v1887_v63, %v1883_v10 }
 0x4d6   : > { %v1478_v51 = vpop.f32.mrb[2].mxu0 }
 0x4d7   : > { %v1482_v52 = vadd.f32 %v1478_v51, %v1404_v48  ;;  %v2113_v53 = vpop.f32.mrb[3].mxu0 }
 0x4d9   : > { %1483 = vst.msk [vmem:[#allocation4 + $0x8] sm:$0xff] %vm301_vm0, %v1482_v52 }
 0x4da   : > { %v1676_v56 = vpop.f32.mrb[4].mxu0 }
 0x4db   : > { %v1680_v57 = vadd.f32 %v1676_v56, %v1602_v54  ;;  %v2123_v58 = vpop.f32.mrb[5].mxu0 }
 0x4dd   : > { %1681 = vst.msk [vmem:[#allocation4 + $0x10] sm:$0xff] %vm301_vm0, %v1680_v57 }
 0x4de   : > { %v1874_v60 = vpop.f32.mrb[6].mxu0 }
 0x4df   : > { %v1878_v61 = vadd.f32 %v1874_v60, %v1800_v59  ;;  %v2133_v62 = vpop.f32.mrb[7].mxu0 }
 0x4e0   : > { %v1892_v2 = vld [vmem:[#allocation4 + $0x8] sm:$0xff] }
 0x4e1   : > { %1879 = vst.msk [vmem:[#allocation4 + $0x18] sm:$0xff] %vm301_vm0, %v1878_v61 }
 0x4e4   : > { %v1901_v5 = vld [vmem:[#allocation4 + $0x10] sm:$0xff] }
 0x4e8   : > { %v1910_v8 = vld [vmem:[#allocation4 + $0x18] sm:$0xff] }
 0x526   : > { %v1896_v1 = vpop.permute.xlu0 %1895 }
 0x527   : > { %v1898_v3 = vmul.f32 %v1896_v1, %v1892_v2 }
 0x529   : > { %1918 = vrot.lane.b32.xlu1 %v1898_v3, %s2225_s29 }
 0x52a   : > { %v1905_v4 = vpop.permute.xlu1 %1904 }
 0x52b   : > { %v1907_v6 = vmul.f32 %v1905_v4, %v1901_v5 }
 0x52d   : > { %1922 = vrot.lane.b32.xlu0 %v1907_v6, %s2226_s30 }
 0x52e   : > { %v1914_v7 = vpop.permute.xlu0 %1913 }
 0x52f   : > { %v1916_v9 = vmul.f32 %v1914_v7, %v1910_v8 }
 0x531   : > { %1926 = vrot.lane.b32.xlu1 %v1916_v9, %s2227_s4 }
 0x59b   : > { %v1919_v11 = vpop.permute.xlu1 %1918 }
 0x59c   : > { %v1929_v17 = vsel %vm301_vm0, %v1889_v12, %v1919_v11 }
 0x59f   : > { %v1923_v14 = vpop.permute.xlu0 %1922 }
 0x5a0   : > { %v1931_v0 = vsel %vm1930_vm4, %v1929_v17, %v1923_v14 }
 0x5a3   : > { %v1927_v18 = vpop.permute.xlu1 %1926 }
 0x5a4   : > { %v1933_v19 = vsel %vm1932_vm5, %v1931_v0, %v1927_v18 }
 0x5a5   : > { %1935 = vst.msk [vmem:[%s287_s7] sm:$0xff] %vm1934_vm6, %v1933_v19 }
 0x5a6 PF: > { %s13_s14 = sadd.s32 1, %s2216_s14   ;;  %s2416_s12 = smov %s2212_s13 }
 0x5a7   : > { %p10_p5 = scmp.ge.s32.totalorder %s13_s14, 4   ;;  %s2417_s13 = smov %s2419_s15 }
 0x5a9   :  { %12 = sbr.rel (!%p10_p5) target bundleno = 2 (0x2), region = 98 }

</bundles_post_ra>
